<compile_context>
chip_gen: v6e
topology: v6e:2x2x1
jax: 0.10.0
libtpu: 0.0.40
codegen_flags: <defaults>
</compile_context>

<pallas_src>
from functools import partial

import numpy as np

import jax
import jax.numpy as jnp
from jax.experimental import pallas as pl
from jax.experimental.pallas import tpu as pltpu


_GATE_BLK = 128  # lane stride of the three gate blocks inside W_rec / g


def _pack_offsets(SB, B, ZW, H, S):
    """Row offsets of the pieces packed into the constant array (shared by
    prepare_params and the kernel; all plain Python ints)."""
    def up8(v):
        return ((v + 7) // 8) * 8
    o = {}
    o["bih0"] = 0                       # (SB, 3H) layer-0 gate bias (pre-broadcast)
    o["b2"] = up8(SB)                   # (SB, ZW) conv2 bias (pre-broadcast)
    o["msel"] = o["b2"] + up8(SB)       # (B, SB)  time-mean selection matrix
    o["wlin"] = o["msel"] + up8(B)      # (B, H)   head weight row (pre-broadcast)
    o["blin"] = o["wlin"] + up8(B)      # (B, S)   head bias (pre-broadcast)
    o["wgi"] = o["blin"] + up8(B)       # (ZW, 3H) layer-0 input projection
    o["rows"] = o["wgi"] + ZW
    o["width"] = max(3 * H, ZW, SB, H, S)
    return o


# ----------------------------------------------------------------------------
# Fused TGCN kernel (single invocation, everything resident in VMEM)
# ----------------------------------------------------------------------------
def _tgcn_kernel(x_ref, k1_ref, k2_ref, wrec_ref, cp_ref, out_ref):
    f32 = jnp.float32
    SB = x_ref.shape[0]                 # seq_len * rnn_batch
    B = out_ref.shape[0]                # rnn batch
    S = SB // B                         # seq_len
    H = (wrec_ref.shape[0] - 1) // 2    # GRU hidden size
    H3 = 3 * H
    ZW = k2_ref.shape[1]                # conv2 output lane width = G_latent * RNN_feat
    off = _pack_offsets(SB, B, ZW, H, S)

    # ---------------- GCN: two folded, lane-dense matmuls --------------------
    # conv1 bias rides in as the last row of k1 (x0 carries a trailing ones col).
    h = jax.nn.sigmoid(
        jnp.dot(x_ref[...], k1_ref[...], preferred_element_type=f32))
    # TODO(synk): F.dropout between conv1/conv2 is identity at inference; skipped.
    b2 = cp_ref[off["b2"]:off["b2"] + SB, 0:ZW]
    z = jax.nn.sigmoid(
        jnp.dot(h, k2_ref[...], preferred_element_type=f32) + b2)   # (SB, ZW)

    # mu/logvar time-means: one selection matmul over the full conv2 output
    # (no strided reductions, no lane slicing of z).
    msel = cp_ref[off["msel"]:off["msel"] + B, 0:SB]
    mlv = jnp.dot(msel, z, preferred_element_type=f32)              # (B, ZW)

    # Layer-0 GRU input projections for every timestep in one matmul
    # (latent channels 1/2 of z hit zero rows of w_gi -> no slicing of z).
    w_gi = cp_ref[off["wgi"]:off["wgi"] + ZW, 0:H3]
    bih0 = cp_ref[off["bih0"]:off["bih0"] + SB, 0:H3]
    gi0_all = jnp.dot(z, w_gi, preferred_element_type=f32) + bih0   # (SB, 3H)

    # ---------------- skewed 2-layer GRU: ONE fused matmul per tick ----------
    wrec = wrec_ref[...]                                  # (2H+1, 3*_GATE_BLK)
    wlin_b = cp_ref[off["wlin"]:off["wlin"] + B, 0:H]
    blin_b = cp_ref[off["blin"]:off["blin"] + B, 0:S]
    ones_c = jnp.ones((B, 1), f32)

    h0 = jnp.zeros((B, H), f32)
    h1 = jnp.zeros((B, H), f32)
    hd = []
    for t in range(S + 1):              # static unroll; S+1 ticks, 1 matmul each
        hcat = jnp.concatenate([h0, h1, ones_c], axis=1)            # (B, 2H+1)
        g = jnp.dot(hcat, wrec, preferred_element_type=f32)         # (B, 384)
        gh0 = g[:, 0:H3]                                 # h0@Whh0  (+b_hn0 in n)
        gi1 = g[:, _GATE_BLK:_GATE_BLK + H3]             # h0@Wih1  (+ih/summed biases)
        gh1 = g[:, 2 * _GATE_BLK:2 * _GATE_BLK + H3]     # h1@Whh1  (+b_hn1 in n)

        if t >= 1:                      # layer-1 processes step t-1
            r1 = jax.nn.sigmoid(gi1[:, 0:H] + gh1[:, 0:H])
            u1 = jax.nn.sigmoid(gi1[:, H:2 * H] + gh1[:, H:2 * H])
            n1 = jnp.tanh(gi1[:, 2 * H:H3] + r1 * gh1[:, 2 * H:H3])
            h1 = n1 + u1 * (h1 - n1)
            # Linear head as a VPU multiply + lane reduction, kept in vregs
            # (no hall scratch, no per-step masked stores, no (SB,1) matmul).
            hd.append(jnp.sum(h1 * wlin_b, axis=-1, keepdims=True))

        if t < S:                       # layer-0 processes step t
            gi0 = gi0_all[t * B:(t + 1) * B, :]
            r0 = jax.nn.sigmoid(gi0[:, 0:H] + gh0[:, 0:H])
            u0 = jax.nn.sigmoid(gi0[:, H:2 * H] + gh0[:, H:2 * H])
            n0 = jnp.tanh(gi0[:, 2 * H:H3] + r0 * gh0[:, 2 * H:H3])
            h0 = n0 + u0 * (h0 - n0)

    head = jnp.concatenate(hd, axis=1) + blin_b                     # (B, S)
    # Single lane-packed store: [ mu/logvar block (B, ZW) | head (B, S) ].
    out_ref[...] = jnp.concatenate([mlv, head], axis=1)


# ----------------------------------------------------------------------------
# Parameter preparation (done ONCE, outside the per-call forward)
# ----------------------------------------------------------------------------
def prepare_params(params, a_hat, seq_len, graph_batch):
    f32 = jnp.float32
    N = a_hat.shape[0]
    L = params["w2"].shape[1]           # G_latent
    R = L * N                           # RNN_feat
    gpb = L                             # graphs folded into one RNN row
    assert graph_batch % gpb == 0, "graph_batch must be divisible by G_latent"
    B = graph_batch // gpb              # rnn batch
    S = seq_len
    SB = S * B
    H = params["whh0"].shape[2]         # GRU hidden size
    ZW = L * R                          # conv2 output lane width
    assert 3 * H <= _GATE_BLK

    a_t = a_hat.T.astype(f32)
    blk = jnp.kron(jnp.eye(gpb, dtype=f32), a_t)        # (R, R): per-graph A_hat^T

    def fold(w):
        # Right-multiplication implementing  X -> A_hat @ (X @ w) + (bias later)
        # per graph, in the (channel, graph-in-group, node) lane layout.
        # Exact construction (pure kron), no prep-time matmul precision issues.
        return jnp.kron(w.astype(f32), blk)             # (cin*R, cout*R)

    # conv1: bias folded in as an extra input row (x0 gets a trailing ones col)
    k1 = fold(params["w1"])
    b1e = jnp.repeat(params["b1"].astype(f32), R, axis=1)           # (1, G_hid*R)
    k1a = jnp.concatenate([k1, b1e], axis=0)

    # conv2
    k2 = fold(params["w2"])                                          # (G_hid*R, ZW)
    b2e = jnp.repeat(params["b2"].astype(f32), R, axis=1)            # (1, ZW)

    # GRU gate-weight prep (PyTorch gate order r, z, n; r/z biases pre-summed,
    # b_hn stays inside r*(h@W_hn + b_hn)).
    def gru_prep(wih, whh, bih, bhh):
        wih_c = jnp.concatenate([wih[0], wih[1], wih[2]], axis=1)    # (in, 3H)
        whh_c = jnp.concatenate([whh[0], whh[1], whh[2]], axis=1)    # (H, 3H)
        bih_c = jnp.concatenate([bih[0] + bhh[0], bih[1] + bhh[1], bih[2]], axis=1)
        return wih_c, whh_c, bih_c, bhh[2]

    wih0c, whh0c, bih0c, bhn0 = gru_prep(params["wih0"], params["whh0"],
                                         params["bih0"], params["bhh0"])
    wih1c, whh1c, bih1c, bhn1 = gru_prep(params["wih1"], params["whh1"],
                                         params["bih1"], params["bhh1"])

    # Fused recurrent weight for the skewed GRU:
    #   [h0 | h1 | 1] @ wrec = [gh0 | gi1 | gh1], gate blocks lane-aligned to 128.
    wrec = jnp.zeros((2 * H + 1, 3 * _GATE_BLK), f32)
    wrec = wrec.at[0:H, 0:3 * H].set(whh0c)
    wrec = wrec.at[2 * H, 2 * H:3 * H].set(bhn0.reshape(-1))
    wrec = wrec.at[0:H, _GATE_BLK:_GATE_BLK + 3 * H].set(wih1c)
    wrec = wrec.at[2 * H, _GATE_BLK:_GATE_BLK + 3 * H].set(bih1c.reshape(-1))
    wrec = wrec.at[H:2 * H, 2 * _GATE_BLK:2 * _GATE_BLK + 3 * H].set(whh1c)
    wrec = wrec.at[2 * H, 2 * _GATE_BLK + 2 * H:2 * _GATE_BLK + 3 * H].set(
        bhn1.reshape(-1))

    # Layer-0 input projection over the FULL conv2 output (channels 1,2 -> 0 rows)
    w_gi = jnp.zeros((ZW, 3 * H), f32).at[0:R, :].set(wih0c)

    # Constant pack: every small operand in one DMA, statically sliced in-kernel.
    off = _pack_offsets(SB, B, ZW, H, S)
    msel = jnp.tile(jnp.eye(B, dtype=f32) / S, (1, S))               # (B, SB)
    wlin_b = jnp.broadcast_to(params["wlin"].astype(f32).T, (B, H))
    blin_b = jnp.broadcast_to(params["blin"].astype(f32), (B, S))
    cpack = jnp.zeros((off["rows"], off["width"]), f32)
    cpack = cpack.at[off["bih0"]:off["bih0"] + SB, 0:3 * H].set(
        jnp.broadcast_to(bih0c, (SB, 3 * H)))
    cpack = cpack.at[off["b2"]:off["b2"] + SB, 0:ZW].set(
        jnp.broadcast_to(b2e, (SB, ZW)))
    cpack = cpack.at[off["msel"]:off["msel"] + B, 0:SB].set(msel)
    cpack = cpack.at[off["wlin"]:off["wlin"] + B, 0:H].set(wlin_b)
    cpack = cpack.at[off["blin"]:off["blin"] + B, 0:S].set(blin_b)
    cpack = cpack.at[off["wgi"]:off["wgi"] + ZW, 0:3 * H].set(w_gi)

    return dict(k1a=k1a, k2=k2, wrec=wrec, cpack=cpack)


# ----------------------------------------------------------------------------
# TGCN forward: one pallas_call, wrapper glue is only tiny layout reshapes
# ----------------------------------------------------------------------------
@partial(jax.jit, static_argnames=("g_latent",))
def tgcn_forward(x, prep, *, g_latent):
    """x: (seq_len, graph_batch, N_nodes, in_feat) -> (out, mu, logvar)."""
    f32 = jnp.float32
    S, Bg, N, F_in = x.shape
    L = g_latent
    R = L * N                           # RNN_feat
    gpb = L
    B = Bg // gpb                       # rnn batch
    SB = S * B
    ZW = prep["k2"].shape[1]            # = L * R

    # GCN input lane layout: row = s*B + j, lane = f*R + g*N + n, plus a
    # trailing ones column carrying the conv1 bias through the fold.
    x0 = (x.astype(f32)
           .reshape(S, B, gpb, N, F_in)
           .transpose(0, 1, 4, 2, 3)
           .reshape(SB, F_in * R))
    x0 = jnp.concatenate([x0, jnp.ones((SB, 1), f32)], axis=1)

    # TODO(synk): this problem size has no extra batch of independent sequences,
    # so there is nothing to shard across a second TensorCore (v7x) or to grow
    # the MXU M-dim with; at larger batch, add a leading "parallel" grid axis.
    vmem_specs = [pl.BlockSpec(memory_space=pltpu.MemorySpace.VMEM)
                  for _ in range(5)]
    o = pl.pallas_call(
        _tgcn_kernel,
        out_shape=jax.ShapeDtypeStruct((B, ZW + S), f32),
        in_specs=vmem_specs,
        out_specs=pl.BlockSpec(memory_space=pltpu.MemorySpace.VMEM),
    )(x0, prep["k1a"], prep["k2"], prep["wrec"], prep["cpack"])

    mu = o[:, R:2 * R].reshape(-1)
    logvar = o[:, 2 * R:3 * R].reshape(-1)
    out = o[:, ZW:ZW + S].T.reshape(S, B, 1)
    return out, mu, logvar


# ----------------------------------------------------------------------------
# Pure-JAX reference (mirrors the PyTorch module), for a tolerance check
# ----------------------------------------------------------------------------
def tgcn_reference(x, params, a_hat):
    f32 = jnp.float32
    S, Bg, N, F_in = x.shape
    L = params["w2"].shape[1]
    R = L * N
    H = params["whh0"].shape[2]
    B = (Bg * N) // R

    def gcn_one(xg):                     # xg: (N, F_in), one graph
        h = jax.nn.sigmoid(a_hat @ (xg @ params["w1"]) + params["b1"])
        return jax.nn.sigmoid(a_hat @ (h @ params["w2"]) + params["b2"])

    g_out = jax.vmap(jax.vmap(gcn_one))(x.astype(f32))      # (S, Bg, N, L)
    g_out = g_out.reshape(S, Bg * N, L)
    mu = g_out[:, :, 1].mean(0)
    logvar = g_out[:, :, 2].mean(0)
    seq = g_out[:, :, 0].reshape(S, B, R)

    def gru_cell(xin, h, wih, whh, bih, bhh):
        gi = (xin @ jnp.concatenate([wih[0], wih[1], wih[2]], axis=1)
              + jnp.concatenate([bih[0], bih[1], bih[2]], axis=1))
        gh = (h @ jnp.concatenate([whh[0], whh[1], whh[2]], axis=1)
              + jnp.concatenate([bhh[0], bhh[1], bhh[2]], axis=1))
        r = jax.nn.sigmoid(gi[:, :H] + gh[:, :H])
        u = jax.nn.sigmoid(gi[:, H:2 * H] + gh[:, H:2 * H])
        n = jnp.tanh(gi[:, 2 * H:] + r * gh[:, 2 * H:])
        return (1.0 - u) * n + u * h

    h0 = jnp.zeros((B, H), f32)
    h1 = jnp.zeros((B, H), f32)
    outs = []
    for s in range(S):
        h0 = gru_cell(seq[s], h0, params["wih0"], params["whh0"],
                      params["bih0"], params["bhh0"])
        h1 = gru_cell(h0, h1, params["wih1"], params["whh1"],
                      params["bih1"], params["bhh1"])
        outs.append(h1 @ params["wlin"] + params["blin"])
    return jnp.stack(outs, 0), mu, logvar


# ----------------------------------------------------------------------------
# Deterministic setup
# ----------------------------------------------------------------------------
def make_edge_index(n_nodes):
    # bidirectional ring graph
    src = list(range(n_nodes)) + [(i + 1) % n_nodes for i in range(n_nodes)]
    dst = [(i + 1) % n_nodes for i in range(n_nodes)] + list(range(n_nodes))
    return jnp.array([src, dst], dtype=jnp.int32)


def normalized_adjacency(edge_index, n_nodes):
    src, dst = edge_index
    a = jnp.zeros((n_nodes, n_nodes), jnp.float32).at[dst, src].set(1.0)
    a = a + jnp.eye(n_nodes, dtype=jnp.float32)          # add self loops
    deg = a.sum(axis=1)
    d_inv_sqrt = 1.0 / jnp.sqrt(deg)
    return a * d_inv_sqrt[:, None] * d_inv_sqrt[None, :]


def init_params(key, f_in, g_hidden, g_latent, rnn_feat, h_out):
    ks = jax.random.split(key, 14)
    u = lambda k, shape: 0.3 * jax.random.uniform(k, shape, jnp.float32, -1.0, 1.0)
    return dict(
        # GCN
        w1=u(ks[0], (f_in, g_hidden)),     b1=u(ks[1], (1, g_hidden)),
        w2=u(ks[2], (g_hidden, g_latent)), b2=u(ks[3], (1, g_latent)),
        # GRU layer 0 (gate order r, z, n)
        wih0=u(ks[4], (3, rnn_feat, h_out)), whh0=u(ks[5], (3, h_out, h_out)),
        bih0=u(ks[6], (3, 1, h_out)),        bhh0=u(ks[7], (3, 1, h_out)),
        # GRU layer 1
        wih1=u(ks[8], (3, h_out, h_out)),    whh1=u(ks[9], (3, h_out, h_out)),
        bih1=u(ks[10], (3, 1, h_out)),       bhh1=u(ks[11], (3, 1, h_out)),
        # Linear head
        wlin=u(ks[12], (h_out, 1)),          blin=u(ks[13], (1, 1)),
    )


if __name__ == "__main__":
    # Small shapes consistent with the module:
    #   seq_len=8, 6 graphs per time step, 8 nodes/graph, in_feat=4,
    #   G_hidden=8, G_latent=3 (forward indexes latent channels 0,1,2),
    #   GRU hidden (out_feat)=32, n_layers=2.
    S, Bg, N, F_in = 8, 6, 8, 4
    G_hidden, G_latent, H_out = 8, 3, 32
    RNN_feat = G_latent * N               # 24; rnn batch = Bg // G_latent = 2

    key = jax.random.PRNGKey(0)
    k_x, k_p = jax.random.split(key)

    edge_index = make_edge_index(N)
    a_hat = normalized_adjacency(edge_index, N)
    params = init_params(k_p, F_in, G_hidden, G_latent, RNN_feat, H_out)
    prep = prepare_params(params, a_hat, S, Bg)

    x = jax.random.normal(k_x, (S, Bg, N, F_in), jnp.float32)

    out, mu, logvar = tgcn_forward(x, prep, g_latent=G_latent)
    jax.block_until_ready((out, mu, logvar))

    B = Bg // G_latent
    assert out.shape == (S, B, 1)
    assert mu.shape == (Bg * N,) and logvar.shape == (Bg * N,)

    # Pure-JAX reference check (per review's correctness concerns).
    with jax.default_matmul_precision("highest"):
        ref_out, ref_mu, ref_lv = tgcn_reference(x, params, a_hat)
    np.testing.assert_allclose(np.asarray(out), np.asarray(ref_out),
                               rtol=5e-3, atol=5e-3)
    np.testing.assert_allclose(np.asarray(mu), np.asarray(ref_mu),
                               rtol=5e-3, atol=5e-3)
    np.testing.assert_allclose(np.asarray(logvar), np.asarray(ref_lv),
                               rtol=5e-3, atol=5e-3)

    print("KERNEL_OK")
</pallas_src>

<mosaic_0001>
module attributes {stable_mosaic.version = 11 : i64} {
  func.func @_tgcn_kernel(%arg0: memref<16x97xf32, #tpu.memory_space<vmem>>, %arg1: memref<97x192xf32, #tpu.memory_space<vmem>>, %arg2: memref<192x72xf32, #tpu.memory_space<vmem>>, %arg3: memref<65x384xf32, #tpu.memory_space<vmem>>, %arg4: memref<128x96xf32, #tpu.memory_space<vmem>>, %arg5: memref<2x80xf32, #tpu.memory_space<vmem>>) attributes {dimension_semantics = [], scalar_prefetch = 0 : i64, scratch_operands = 0 : i64, tpu.core_type = #tpu.core_type<tc>} {
    %c0 = arith.constant 0 : index
    %c0_0 = arith.constant 0 : index
    %0 = vector.load %arg0[%c0, %c0_0] : memref<16x97xf32, #tpu.memory_space<vmem>>, vector<16x97xf32>
    %c0_1 = arith.constant 0 : index
    %c0_2 = arith.constant 0 : index
    %1 = vector.load %arg1[%c0_1, %c0_2] : memref<97x192xf32, #tpu.memory_space<vmem>>, vector<97x192xf32>
    %cst = arith.constant dense<0.000000e+00> : vector<16x192xf32>
    %2 = tpu.matmul %0, %1, %cst {dimension_numbers = #tpu.dot_dimension_numbers<[1], [0], [0], [1], [0, 0, 1, 1], [], []>} : vector<16x97xf32>, vector<97x192xf32>, vector<16x192xf32> -> vector<16x192xf32>
    %3 = arith.negf %2 : vector<16x192xf32>
    %4 = math.exp %3 : vector<16x192xf32>
    %cst_3 = arith.constant 1.000000e+00 : f32
    %5 = vector.broadcast %cst_3 : f32 to vector<16x192xf32>
    %6 = arith.addf %5, %4 : vector<16x192xf32>
    %7 = arith.divf %5, %6 : vector<16x192xf32>
    %c16 = arith.constant 16 : index
    %c0_4 = arith.constant 0 : index
    %8 = vector.load %arg4[%c16, %c0_4] : memref<128x96xf32, #tpu.memory_space<vmem>>, vector<16x72xf32>
    %c0_5 = arith.constant 0 : index
    %c0_6 = arith.constant 0 : index
    %9 = vector.load %arg2[%c0_5, %c0_6] : memref<192x72xf32, #tpu.memory_space<vmem>>, vector<192x72xf32>
    %cst_7 = arith.constant dense<0.000000e+00> : vector<16x72xf32>
    %10 = tpu.matmul %7, %9, %cst_7 {dimension_numbers = #tpu.dot_dimension_numbers<[1], [0], [0], [1], [0, 0, 1, 1], [], []>} : vector<16x192xf32>, vector<192x72xf32>, vector<16x72xf32> -> vector<16x72xf32>
    %11 = arith.addf %10, %8 : vector<16x72xf32>
    %12 = arith.negf %11 : vector<16x72xf32>
    %13 = math.exp %12 : vector<16x72xf32>
    %cst_8 = arith.constant 1.000000e+00 : f32
    %14 = vector.broadcast %cst_8 : f32 to vector<16x72xf32>
    %15 = arith.addf %14, %13 : vector<16x72xf32>
    %16 = arith.divf %14, %15 : vector<16x72xf32>
    %c32 = arith.constant 32 : index
    %c0_9 = arith.constant 0 : index
    %17 = vector.load %arg4[%c32, %c0_9] : memref<128x96xf32, #tpu.memory_space<vmem>>, vector<2x16xf32>
    %cst_10 = arith.constant dense<0.000000e+00> : vector<2x72xf32>
    %18 = tpu.matmul %17, %16, %cst_10 {dimension_numbers = #tpu.dot_dimension_numbers<[1], [0], [0], [1], [0, 0, 1, 1], [], []>} : vector<2x16xf32>, vector<16x72xf32>, vector<2x72xf32> -> vector<2x72xf32>
    %c56 = arith.constant 56 : index
    %c0_11 = arith.constant 0 : index
    %19 = vector.load %arg4[%c56, %c0_11] : memref<128x96xf32, #tpu.memory_space<vmem>>, vector<72x96xf32>
    %c0_12 = arith.constant 0 : index
    %c0_13 = arith.constant 0 : index
    %20 = vector.load %arg4[%c0_12, %c0_13] : memref<128x96xf32, #tpu.memory_space<vmem>>, vector<16x96xf32>
    %cst_14 = arith.constant dense<0.000000e+00> : vector<16x96xf32>
    %21 = tpu.matmul %16, %19, %cst_14 {dimension_numbers = #tpu.dot_dimension_numbers<[1], [0], [0], [1], [0, 0, 1, 1], [], []>} : vector<16x72xf32>, vector<72x96xf32>, vector<16x96xf32> -> vector<16x96xf32>
    %22 = arith.addf %21, %20 : vector<16x96xf32>
    %c0_15 = arith.constant 0 : index
    %c0_16 = arith.constant 0 : index
    %23 = vector.load %arg3[%c0_15, %c0_16] : memref<65x384xf32, #tpu.memory_space<vmem>>, vector<65x384xf32>
    %c40 = arith.constant 40 : index
    %c0_17 = arith.constant 0 : index
    %24 = vector.load %arg4[%c40, %c0_17] : memref<128x96xf32, #tpu.memory_space<vmem>>, vector<2x32xf32>
    %c48 = arith.constant 48 : index
    %c0_18 = arith.constant 0 : index
    %25 = vector.load %arg4[%c48, %c0_18] : memref<128x96xf32, #tpu.memory_space<vmem>>, vector<2x8xf32>
    %cst_19 = arith.constant 1.000000e+00 : f32
    %26 = vector.broadcast %cst_19 : f32 to vector<2x1xf32>
    %cst_20 = arith.constant 0.000000e+00 : f32
    %27 = vector.broadcast %cst_20 : f32 to vector<2x32xf32>
    %cst_21 = arith.constant 0.000000e+00 : f32
    %28 = vector.broadcast %cst_21 : f32 to vector<2x32xf32>
    %29 = tpu.concatenate %27, %28, %26 in 1 : vector<2x32xf32>, vector<2x32xf32>, vector<2x1xf32> -> vector<2x65xf32>
    %cst_22 = arith.constant dense<0.000000e+00> : vector<2x384xf32>
    %30 = tpu.matmul %29, %23, %cst_22 {dimension_numbers = #tpu.dot_dimension_numbers<[1], [0], [0], [1], [0, 0, 1, 1], [], []>} : vector<2x65xf32>, vector<65x384xf32>, vector<2x384xf32> -> vector<2x384xf32>
    %31 = vector.extract_strided_slice %30 {offsets = [0, 0], sizes = [2, 96], strides = [1, 1]} : vector<2x384xf32> to vector<2x96xf32>
    %32 = vector.extract_strided_slice %22 {offsets = [0, 0], sizes = [2, 96], strides = [1, 1]} : vector<16x96xf32> to vector<2x96xf32>
    %33 = vector.extract_strided_slice %32 {offsets = [0, 0], sizes = [2, 32], strides = [1, 1]} : vector<2x96xf32> to vector<2x32xf32>
    %34 = vector.extract_strided_slice %31 {offsets = [0, 0], sizes = [2, 32], strides = [1, 1]} : vector<2x96xf32> to vector<2x32xf32>
    %35 = arith.addf %33, %34 : vector<2x32xf32>
    %36 = arith.negf %35 : vector<2x32xf32>
    %37 = math.exp %36 : vector<2x32xf32>
    %cst_23 = arith.constant 1.000000e+00 : f32
    %38 = vector.broadcast %cst_23 : f32 to vector<2x32xf32>
    %39 = arith.addf %38, %37 : vector<2x32xf32>
    %40 = arith.divf %38, %39 : vector<2x32xf32>
    %41 = vector.extract_strided_slice %32 {offsets = [0, 32], sizes = [2, 32], strides = [1, 1]} : vector<2x96xf32> to vector<2x32xf32>
    %42 = vector.extract_strided_slice %31 {offsets = [0, 32], sizes = [2, 32], strides = [1, 1]} : vector<2x96xf32> to vector<2x32xf32>
    %43 = arith.addf %41, %42 : vector<2x32xf32>
    %44 = arith.negf %43 : vector<2x32xf32>
    %45 = math.exp %44 : vector<2x32xf32>
    %cst_24 = arith.constant 1.000000e+00 : f32
    %46 = vector.broadcast %cst_24 : f32 to vector<2x32xf32>
    %47 = arith.addf %46, %45 : vector<2x32xf32>
    %48 = arith.divf %46, %47 : vector<2x32xf32>
    %49 = vector.extract_strided_slice %32 {offsets = [0, 64], sizes = [2, 32], strides = [1, 1]} : vector<2x96xf32> to vector<2x32xf32>
    %50 = vector.extract_strided_slice %31 {offsets = [0, 64], sizes = [2, 32], strides = [1, 1]} : vector<2x96xf32> to vector<2x32xf32>
    %51 = arith.mulf %40, %50 : vector<2x32xf32>
    %52 = arith.addf %49, %51 : vector<2x32xf32>
    %53 = math.tanh %52 : vector<2x32xf32>
    %54 = arith.subf %27, %53 : vector<2x32xf32>
    %55 = arith.mulf %48, %54 : vector<2x32xf32>
    %56 = arith.addf %53, %55 : vector<2x32xf32>
    %57 = tpu.concatenate %56, %28, %26 in 1 : vector<2x32xf32>, vector<2x32xf32>, vector<2x1xf32> -> vector<2x65xf32>
    %cst_25 = arith.constant dense<0.000000e+00> : vector<2x384xf32>
    %58 = tpu.matmul %57, %23, %cst_25 {dimension_numbers = #tpu.dot_dimension_numbers<[1], [0], [0], [1], [0, 0, 1, 1], [], []>} : vector<2x65xf32>, vector<65x384xf32>, vector<2x384xf32> -> vector<2x384xf32>
    %59 = vector.extract_strided_slice %58 {offsets = [0, 0], sizes = [2, 96], strides = [1, 1]} : vector<2x384xf32> to vector<2x96xf32>
    %60 = vector.extract_strided_slice %58 {offsets = [0, 128], sizes = [2, 96], strides = [1, 1]} : vector<2x384xf32> to vector<2x96xf32>
    %61 = vector.extract_strided_slice %58 {offsets = [0, 256], sizes = [2, 96], strides = [1, 1]} : vector<2x384xf32> to vector<2x96xf32>
    %62 = vector.extract_strided_slice %60 {offsets = [0, 0], sizes = [2, 32], strides = [1, 1]} : vector<2x96xf32> to vector<2x32xf32>
    %63 = vector.extract_strided_slice %61 {offsets = [0, 0], sizes = [2, 32], strides = [1, 1]} : vector<2x96xf32> to vector<2x32xf32>
    %64 = arith.addf %62, %63 : vector<2x32xf32>
    %65 = arith.negf %64 : vector<2x32xf32>
    %66 = math.exp %65 : vector<2x32xf32>
    %cst_26 = arith.constant 1.000000e+00 : f32
    %67 = vector.broadcast %cst_26 : f32 to vector<2x32xf32>
    %68 = arith.addf %67, %66 : vector<2x32xf32>
    %69 = arith.divf %67, %68 : vector<2x32xf32>
    %70 = vector.extract_strided_slice %60 {offsets = [0, 32], sizes = [2, 32], strides = [1, 1]} : vector<2x96xf32> to vector<2x32xf32>
    %71 = vector.extract_strided_slice %61 {offsets = [0, 32], sizes = [2, 32], strides = [1, 1]} : vector<2x96xf32> to vector<2x32xf32>
    %72 = arith.addf %70, %71 : vector<2x32xf32>
    %73 = arith.negf %72 : vector<2x32xf32>
    %74 = math.exp %73 : vector<2x32xf32>
    %cst_27 = arith.constant 1.000000e+00 : f32
    %75 = vector.broadcast %cst_27 : f32 to vector<2x32xf32>
    %76 = arith.addf %75, %74 : vector<2x32xf32>
    %77 = arith.divf %75, %76 : vector<2x32xf32>
    %78 = vector.extract_strided_slice %60 {offsets = [0, 64], sizes = [2, 32], strides = [1, 1]} : vector<2x96xf32> to vector<2x32xf32>
    %79 = vector.extract_strided_slice %61 {offsets = [0, 64], sizes = [2, 32], strides = [1, 1]} : vector<2x96xf32> to vector<2x32xf32>
    %80 = arith.mulf %69, %79 : vector<2x32xf32>
    %81 = arith.addf %78, %80 : vector<2x32xf32>
    %82 = math.tanh %81 : vector<2x32xf32>
    %83 = arith.subf %28, %82 : vector<2x32xf32>
    %84 = arith.mulf %77, %83 : vector<2x32xf32>
    %85 = arith.addf %82, %84 : vector<2x32xf32>
    %86 = arith.mulf %85, %24 : vector<2x32xf32>
    %cst_28 = arith.constant dense<0.000000e+00> : vector<2xf32>
    %87 = vector.multi_reduction <add>, %86, %cst_28 [1] : vector<2x32xf32> to vector<2xf32>
    %88 = vector.shape_cast %87 : vector<2xf32> to vector<2x1xf32>
    %89 = vector.extract_strided_slice %22 {offsets = [2, 0], sizes = [2, 96], strides = [1, 1]} : vector<16x96xf32> to vector<2x96xf32>
    %90 = vector.extract_strided_slice %89 {offsets = [0, 0], sizes = [2, 32], strides = [1, 1]} : vector<2x96xf32> to vector<2x32xf32>
    %91 = vector.extract_strided_slice %59 {offsets = [0, 0], sizes = [2, 32], strides = [1, 1]} : vector<2x96xf32> to vector<2x32xf32>
    %92 = arith.addf %90, %91 : vector<2x32xf32>
    %93 = arith.negf %92 : vector<2x32xf32>
    %94 = math.exp %93 : vector<2x32xf32>
    %cst_29 = arith.constant 1.000000e+00 : f32
    %95 = vector.broadcast %cst_29 : f32 to vector<2x32xf32>
    %96 = arith.addf %95, %94 : vector<2x32xf32>
    %97 = arith.divf %95, %96 : vector<2x32xf32>
    %98 = vector.extract_strided_slice %89 {offsets = [0, 32], sizes = [2, 32], strides = [1, 1]} : vector<2x96xf32> to vector<2x32xf32>
    %99 = vector.extract_strided_slice %59 {offsets = [0, 32], sizes = [2, 32], strides = [1, 1]} : vector<2x96xf32> to vector<2x32xf32>
    %100 = arith.addf %98, %99 : vector<2x32xf32>
    %101 = arith.negf %100 : vector<2x32xf32>
    %102 = math.exp %101 : vector<2x32xf32>
    %cst_30 = arith.constant 1.000000e+00 : f32
    %103 = vector.broadcast %cst_30 : f32 to vector<2x32xf32>
    %104 = arith.addf %103, %102 : vector<2x32xf32>
    %105 = arith.divf %103, %104 : vector<2x32xf32>
    %106 = vector.extract_strided_slice %89 {offsets = [0, 64], sizes = [2, 32], strides = [1, 1]} : vector<2x96xf32> to vector<2x32xf32>
    %107 = vector.extract_strided_slice %59 {offsets = [0, 64], sizes = [2, 32], strides = [1, 1]} : vector<2x96xf32> to vector<2x32xf32>
    %108 = arith.mulf %97, %107 : vector<2x32xf32>
    %109 = arith.addf %106, %108 : vector<2x32xf32>
    %110 = math.tanh %109 : vector<2x32xf32>
    %111 = arith.subf %56, %110 : vector<2x32xf32>
    %112 = arith.mulf %105, %111 : vector<2x32xf32>
    %113 = arith.addf %110, %112 : vector<2x32xf32>
    %114 = tpu.concatenate %113, %85, %26 in 1 : vector<2x32xf32>, vector<2x32xf32>, vector<2x1xf32> -> vector<2x65xf32>
    %cst_31 = arith.constant dense<0.000000e+00> : vector<2x384xf32>
    %115 = tpu.matmul %114, %23, %cst_31 {dimension_numbers = #tpu.dot_dimension_numbers<[1], [0], [0], [1], [0, 0, 1, 1], [], []>} : vector<2x65xf32>, vector<65x384xf32>, vector<2x384xf32> -> vector<2x384xf32>
    %116 = vector.extract_strided_slice %115 {offsets = [0, 0], sizes = [2, 96], strides = [1, 1]} : vector<2x384xf32> to vector<2x96xf32>
    %117 = vector.extract_strided_slice %115 {offsets = [0, 128], sizes = [2, 96], strides = [1, 1]} : vector<2x384xf32> to vector<2x96xf32>
    %118 = vector.extract_strided_slice %115 {offsets = [0, 256], sizes = [2, 96], strides = [1, 1]} : vector<2x384xf32> to vector<2x96xf32>
    %119 = vector.extract_strided_slice %117 {offsets = [0, 0], sizes = [2, 32], strides = [1, 1]} : vector<2x96xf32> to vector<2x32xf32>
    %120 = vector.extract_strided_slice %118 {offsets = [0, 0], sizes = [2, 32], strides = [1, 1]} : vector<2x96xf32> to vector<2x32xf32>
    %121 = arith.addf %119, %120 : vector<2x32xf32>
    %122 = arith.negf %121 : vector<2x32xf32>
    %123 = math.exp %122 : vector<2x32xf32>
    %cst_32 = arith.constant 1.000000e+00 : f32
    %124 = vector.broadcast %cst_32 : f32 to vector<2x32xf32>
    %125 = arith.addf %124, %123 : vector<2x32xf32>
    %126 = arith.divf %124, %125 : vector<2x32xf32>
    %127 = vector.extract_strided_slice %117 {offsets = [0, 32], sizes = [2, 32], strides = [1, 1]} : vector<2x96xf32> to vector<2x32xf32>
    %128 = vector.extract_strided_slice %118 {offsets = [0, 32], sizes = [2, 32], strides = [1, 1]} : vector<2x96xf32> to vector<2x32xf32>
    %129 = arith.addf %127, %128 : vector<2x32xf32>
    %130 = arith.negf %129 : vector<2x32xf32>
    %131 = math.exp %130 : vector<2x32xf32>
    %cst_33 = arith.constant 1.000000e+00 : f32
    %132 = vector.broadcast %cst_33 : f32 to vector<2x32xf32>
    %133 = arith.addf %132, %131 : vector<2x32xf32>
    %134 = arith.divf %132, %133 : vector<2x32xf32>
    %135 = vector.extract_strided_slice %117 {offsets = [0, 64], sizes = [2, 32], strides = [1, 1]} : vector<2x96xf32> to vector<2x32xf32>
    %136 = vector.extract_strided_slice %118 {offsets = [0, 64], sizes = [2, 32], strides = [1, 1]} : vector<2x96xf32> to vector<2x32xf32>
    %137 = arith.mulf %126, %136 : vector<2x32xf32>
    %138 = arith.addf %135, %137 : vector<2x32xf32>
    %139 = math.tanh %138 : vector<2x32xf32>
    %140 = arith.subf %85, %139 : vector<2x32xf32>
    %141 = arith.mulf %134, %140 : vector<2x32xf32>
    %142 = arith.addf %139, %141 : vector<2x32xf32>
    %143 = arith.mulf %142, %24 : vector<2x32xf32>
    %cst_34 = arith.constant dense<0.000000e+00> : vector<2xf32>
    %144 = vector.multi_reduction <add>, %143, %cst_34 [1] : vector<2x32xf32> to vector<2xf32>
    %145 = vector.shape_cast %144 : vector<2xf32> to vector<2x1xf32>
    %146 = vector.extract_strided_slice %22 {offsets = [4, 0], sizes = [2, 96], strides = [1, 1]} : vector<16x96xf32> to vector<2x96xf32>
    %147 = vector.extract_strided_slice %146 {offsets = [0, 0], sizes = [2, 32], strides = [1, 1]} : vector<2x96xf32> to vector<2x32xf32>
    %148 = vector.extract_strided_slice %116 {offsets = [0, 0], sizes = [2, 32], strides = [1, 1]} : vector<2x96xf32> to vector<2x32xf32>
    %149 = arith.addf %147, %148 : vector<2x32xf32>
    %150 = arith.negf %149 : vector<2x32xf32>
    %151 = math.exp %150 : vector<2x32xf32>
    %cst_35 = arith.constant 1.000000e+00 : f32
    %152 = vector.broadcast %cst_35 : f32 to vector<2x32xf32>
    %153 = arith.addf %152, %151 : vector<2x32xf32>
    %154 = arith.divf %152, %153 : vector<2x32xf32>
    %155 = vector.extract_strided_slice %146 {offsets = [0, 32], sizes = [2, 32], strides = [1, 1]} : vector<2x96xf32> to vector<2x32xf32>
    %156 = vector.extract_strided_slice %116 {offsets = [0, 32], sizes = [2, 32], strides = [1, 1]} : vector<2x96xf32> to vector<2x32xf32>
    %157 = arith.addf %155, %156 : vector<2x32xf32>
    %158 = arith.negf %157 : vector<2x32xf32>
    %159 = math.exp %158 : vector<2x32xf32>
    %cst_36 = arith.constant 1.000000e+00 : f32
    %160 = vector.broadcast %cst_36 : f32 to vector<2x32xf32>
    %161 = arith.addf %160, %159 : vector<2x32xf32>
    %162 = arith.divf %160, %161 : vector<2x32xf32>
    %163 = vector.extract_strided_slice %146 {offsets = [0, 64], sizes = [2, 32], strides = [1, 1]} : vector<2x96xf32> to vector<2x32xf32>
    %164 = vector.extract_strided_slice %116 {offsets = [0, 64], sizes = [2, 32], strides = [1, 1]} : vector<2x96xf32> to vector<2x32xf32>
    %165 = arith.mulf %154, %164 : vector<2x32xf32>
    %166 = arith.addf %163, %165 : vector<2x32xf32>
    %167 = math.tanh %166 : vector<2x32xf32>
    %168 = arith.subf %113, %167 : vector<2x32xf32>
    %169 = arith.mulf %162, %168 : vector<2x32xf32>
    %170 = arith.addf %167, %169 : vector<2x32xf32>
    %171 = tpu.concatenate %170, %142, %26 in 1 : vector<2x32xf32>, vector<2x32xf32>, vector<2x1xf32> -> vector<2x65xf32>
    %cst_37 = arith.constant dense<0.000000e+00> : vector<2x384xf32>
    %172 = tpu.matmul %171, %23, %cst_37 {dimension_numbers = #tpu.dot_dimension_numbers<[1], [0], [0], [1], [0, 0, 1, 1], [], []>} : vector<2x65xf32>, vector<65x384xf32>, vector<2x384xf32> -> vector<2x384xf32>
    %173 = vector.extract_strided_slice %172 {offsets = [0, 0], sizes = [2, 96], strides = [1, 1]} : vector<2x384xf32> to vector<2x96xf32>
    %174 = vector.extract_strided_slice %172 {offsets = [0, 128], sizes = [2, 96], strides = [1, 1]} : vector<2x384xf32> to vector<2x96xf32>
    %175 = vector.extract_strided_slice %172 {offsets = [0, 256], sizes = [2, 96], strides = [1, 1]} : vector<2x384xf32> to vector<2x96xf32>
    %176 = vector.extract_strided_slice %174 {offsets = [0, 0], sizes = [2, 32], strides = [1, 1]} : vector<2x96xf32> to vector<2x32xf32>
    %177 = vector.extract_strided_slice %175 {offsets = [0, 0], sizes = [2, 32], strides = [1, 1]} : vector<2x96xf32> to vector<2x32xf32>
    %178 = arith.addf %176, %177 : vector<2x32xf32>
    %179 = arith.negf %178 : vector<2x32xf32>
    %180 = math.exp %179 : vector<2x32xf32>
    %cst_38 = arith.constant 1.000000e+00 : f32
    %181 = vector.broadcast %cst_38 : f32 to vector<2x32xf32>
    %182 = arith.addf %181, %180 : vector<2x32xf32>
    %183 = arith.divf %181, %182 : vector<2x32xf32>
    %184 = vector.extract_strided_slice %174 {offsets = [0, 32], sizes = [2, 32], strides = [1, 1]} : vector<2x96xf32> to vector<2x32xf32>
    %185 = vector.extract_strided_slice %175 {offsets = [0, 32], sizes = [2, 32], strides = [1, 1]} : vector<2x96xf32> to vector<2x32xf32>
    %186 = arith.addf %184, %185 : vector<2x32xf32>
    %187 = arith.negf %186 : vector<2x32xf32>
    %188 = math.exp %187 : vector<2x32xf32>
    %cst_39 = arith.constant 1.000000e+00 : f32
    %189 = vector.broadcast %cst_39 : f32 to vector<2x32xf32>
    %190 = arith.addf %189, %188 : vector<2x32xf32>
    %191 = arith.divf %189, %190 : vector<2x32xf32>
    %192 = vector.extract_strided_slice %174 {offsets = [0, 64], sizes = [2, 32], strides = [1, 1]} : vector<2x96xf32> to vector<2x32xf32>
    %193 = vector.extract_strided_slice %175 {offsets = [0, 64], sizes = [2, 32], strides = [1, 1]} : vector<2x96xf32> to vector<2x32xf32>
    %194 = arith.mulf %183, %193 : vector<2x32xf32>
    %195 = arith.addf %192, %194 : vector<2x32xf32>
    %196 = math.tanh %195 : vector<2x32xf32>
    %197 = arith.subf %142, %196 : vector<2x32xf32>
    %198 = arith.mulf %191, %197 : vector<2x32xf32>
    %199 = arith.addf %196, %198 : vector<2x32xf32>
    %200 = arith.mulf %199, %24 : vector<2x32xf32>
    %cst_40 = arith.constant dense<0.000000e+00> : vector<2xf32>
    %201 = vector.multi_reduction <add>, %200, %cst_40 [1] : vector<2x32xf32> to vector<2xf32>
    %202 = vector.shape_cast %201 : vector<2xf32> to vector<2x1xf32>
    %203 = vector.extract_strided_slice %22 {offsets = [6, 0], sizes = [2, 96], strides = [1, 1]} : vector<16x96xf32> to vector<2x96xf32>
    %204 = vector.extract_strided_slice %203 {offsets = [0, 0], sizes = [2, 32], strides = [1, 1]} : vector<2x96xf32> to vector<2x32xf32>
    %205 = vector.extract_strided_slice %173 {offsets = [0, 0], sizes = [2, 32], strides = [1, 1]} : vector<2x96xf32> to vector<2x32xf32>
    %206 = arith.addf %204, %205 : vector<2x32xf32>
    %207 = arith.negf %206 : vector<2x32xf32>
    %208 = math.exp %207 : vector<2x32xf32>
    %cst_41 = arith.constant 1.000000e+00 : f32
    %209 = vector.broadcast %cst_41 : f32 to vector<2x32xf32>
    %210 = arith.addf %209, %208 : vector<2x32xf32>
    %211 = arith.divf %209, %210 : vector<2x32xf32>
    %212 = vector.extract_strided_slice %203 {offsets = [0, 32], sizes = [2, 32], strides = [1, 1]} : vector<2x96xf32> to vector<2x32xf32>
    %213 = vector.extract_strided_slice %173 {offsets = [0, 32], sizes = [2, 32], strides = [1, 1]} : vector<2x96xf32> to vector<2x32xf32>
    %214 = arith.addf %212, %213 : vector<2x32xf32>
    %215 = arith.negf %214 : vector<2x32xf32>
    %216 = math.exp %215 : vector<2x32xf32>
    %cst_42 = arith.constant 1.000000e+00 : f32
    %217 = vector.broadcast %cst_42 : f32 to vector<2x32xf32>
    %218 = arith.addf %217, %216 : vector<2x32xf32>
    %219 = arith.divf %217, %218 : vector<2x32xf32>
    %220 = vector.extract_strided_slice %203 {offsets = [0, 64], sizes = [2, 32], strides = [1, 1]} : vector<2x96xf32> to vector<2x32xf32>
    %221 = vector.extract_strided_slice %173 {offsets = [0, 64], sizes = [2, 32], strides = [1, 1]} : vector<2x96xf32> to vector<2x32xf32>
    %222 = arith.mulf %211, %221 : vector<2x32xf32>
    %223 = arith.addf %220, %222 : vector<2x32xf32>
    %224 = math.tanh %223 : vector<2x32xf32>
    %225 = arith.subf %170, %224 : vector<2x32xf32>
    %226 = arith.mulf %219, %225 : vector<2x32xf32>
    %227 = arith.addf %224, %226 : vector<2x32xf32>
    %228 = tpu.concatenate %227, %199, %26 in 1 : vector<2x32xf32>, vector<2x32xf32>, vector<2x1xf32> -> vector<2x65xf32>
    %cst_43 = arith.constant dense<0.000000e+00> : vector<2x384xf32>
    %229 = tpu.matmul %228, %23, %cst_43 {dimension_numbers = #tpu.dot_dimension_numbers<[1], [0], [0], [1], [0, 0, 1, 1], [], []>} : vector<2x65xf32>, vector<65x384xf32>, vector<2x384xf32> -> vector<2x384xf32>
    %230 = vector.extract_strided_slice %229 {offsets = [0, 0], sizes = [2, 96], strides = [1, 1]} : vector<2x384xf32> to vector<2x96xf32>
    %231 = vector.extract_strided_slice %229 {offsets = [0, 128], sizes = [2, 96], strides = [1, 1]} : vector<2x384xf32> to vector<2x96xf32>
    %232 = vector.extract_strided_slice %229 {offsets = [0, 256], sizes = [2, 96], strides = [1, 1]} : vector<2x384xf32> to vector<2x96xf32>
    %233 = vector.extract_strided_slice %231 {offsets = [0, 0], sizes = [2, 32], strides = [1, 1]} : vector<2x96xf32> to vector<2x32xf32>
    %234 = vector.extract_strided_slice %232 {offsets = [0, 0], sizes = [2, 32], strides = [1, 1]} : vector<2x96xf32> to vector<2x32xf32>
    %235 = arith.addf %233, %234 : vector<2x32xf32>
    %236 = arith.negf %235 : vector<2x32xf32>
    %237 = math.exp %236 : vector<2x32xf32>
    %cst_44 = arith.constant 1.000000e+00 : f32
    %238 = vector.broadcast %cst_44 : f32 to vector<2x32xf32>
    %239 = arith.addf %238, %237 : vector<2x32xf32>
    %240 = arith.divf %238, %239 : vector<2x32xf32>
    %241 = vector.extract_strided_slice %231 {offsets = [0, 32], sizes = [2, 32], strides = [1, 1]} : vector<2x96xf32> to vector<2x32xf32>
    %242 = vector.extract_strided_slice %232 {offsets = [0, 32], sizes = [2, 32], strides = [1, 1]} : vector<2x96xf32> to vector<2x32xf32>
    %243 = arith.addf %241, %242 : vector<2x32xf32>
    %244 = arith.negf %243 : vector<2x32xf32>
    %245 = math.exp %244 : vector<2x32xf32>
    %cst_45 = arith.constant 1.000000e+00 : f32
    %246 = vector.broadcast %cst_45 : f32 to vector<2x32xf32>
    %247 = arith.addf %246, %245 : vector<2x32xf32>
    %248 = arith.divf %246, %247 : vector<2x32xf32>
    %249 = vector.extract_strided_slice %231 {offsets = [0, 64], sizes = [2, 32], strides = [1, 1]} : vector<2x96xf32> to vector<2x32xf32>
    %250 = vector.extract_strided_slice %232 {offsets = [0, 64], sizes = [2, 32], strides = [1, 1]} : vector<2x96xf32> to vector<2x32xf32>
    %251 = arith.mulf %240, %250 : vector<2x32xf32>
    %252 = arith.addf %249, %251 : vector<2x32xf32>
    %253 = math.tanh %252 : vector<2x32xf32>
    %254 = arith.subf %199, %253 : vector<2x32xf32>
    %255 = arith.mulf %248, %254 : vector<2x32xf32>
    %256 = arith.addf %253, %255 : vector<2x32xf32>
    %257 = arith.mulf %256, %24 : vector<2x32xf32>
    %cst_46 = arith.constant dense<0.000000e+00> : vector<2xf32>
    %258 = vector.multi_reduction <add>, %257, %cst_46 [1] : vector<2x32xf32> to vector<2xf32>
    %259 = vector.shape_cast %258 : vector<2xf32> to vector<2x1xf32>
    %260 = vector.extract_strided_slice %22 {offsets = [8, 0], sizes = [2, 96], strides = [1, 1]} : vector<16x96xf32> to vector<2x96xf32>
    %261 = vector.extract_strided_slice %260 {offsets = [0, 0], sizes = [2, 32], strides = [1, 1]} : vector<2x96xf32> to vector<2x32xf32>
    %262 = vector.extract_strided_slice %230 {offsets = [0, 0], sizes = [2, 32], strides = [1, 1]} : vector<2x96xf32> to vector<2x32xf32>
    %263 = arith.addf %261, %262 : vector<2x32xf32>
    %264 = arith.negf %263 : vector<2x32xf32>
    %265 = math.exp %264 : vector<2x32xf32>
    %cst_47 = arith.constant 1.000000e+00 : f32
    %266 = vector.broadcast %cst_47 : f32 to vector<2x32xf32>
    %267 = arith.addf %266, %265 : vector<2x32xf32>
    %268 = arith.divf %266, %267 : vector<2x32xf32>
    %269 = vector.extract_strided_slice %260 {offsets = [0, 32], sizes = [2, 32], strides = [1, 1]} : vector<2x96xf32> to vector<2x32xf32>
    %270 = vector.extract_strided_slice %230 {offsets = [0, 32], sizes = [2, 32], strides = [1, 1]} : vector<2x96xf32> to vector<2x32xf32>
    %271 = arith.addf %269, %270 : vector<2x32xf32>
    %272 = arith.negf %271 : vector<2x32xf32>
    %273 = math.exp %272 : vector<2x32xf32>
    %cst_48 = arith.constant 1.000000e+00 : f32
    %274 = vector.broadcast %cst_48 : f32 to vector<2x32xf32>
    %275 = arith.addf %274, %273 : vector<2x32xf32>
    %276 = arith.divf %274, %275 : vector<2x32xf32>
    %277 = vector.extract_strided_slice %260 {offsets = [0, 64], sizes = [2, 32], strides = [1, 1]} : vector<2x96xf32> to vector<2x32xf32>
    %278 = vector.extract_strided_slice %230 {offsets = [0, 64], sizes = [2, 32], strides = [1, 1]} : vector<2x96xf32> to vector<2x32xf32>
    %279 = arith.mulf %268, %278 : vector<2x32xf32>
    %280 = arith.addf %277, %279 : vector<2x32xf32>
    %281 = math.tanh %280 : vector<2x32xf32>
    %282 = arith.subf %227, %281 : vector<2x32xf32>
    %283 = arith.mulf %276, %282 : vector<2x32xf32>
    %284 = arith.addf %281, %283 : vector<2x32xf32>
    %285 = tpu.concatenate %284, %256, %26 in 1 : vector<2x32xf32>, vector<2x32xf32>, vector<2x1xf32> -> vector<2x65xf32>
    %cst_49 = arith.constant dense<0.000000e+00> : vector<2x384xf32>
    %286 = tpu.matmul %285, %23, %cst_49 {dimension_numbers = #tpu.dot_dimension_numbers<[1], [0], [0], [1], [0, 0, 1, 1], [], []>} : vector<2x65xf32>, vector<65x384xf32>, vector<2x384xf32> -> vector<2x384xf32>
    %287 = vector.extract_strided_slice %286 {offsets = [0, 0], sizes = [2, 96], strides = [1, 1]} : vector<2x384xf32> to vector<2x96xf32>
    %288 = vector.extract_strided_slice %286 {offsets = [0, 128], sizes = [2, 96], strides = [1, 1]} : vector<2x384xf32> to vector<2x96xf32>
    %289 = vector.extract_strided_slice %286 {offsets = [0, 256], sizes = [2, 96], strides = [1, 1]} : vector<2x384xf32> to vector<2x96xf32>
    %290 = vector.extract_strided_slice %288 {offsets = [0, 0], sizes = [2, 32], strides = [1, 1]} : vector<2x96xf32> to vector<2x32xf32>
    %291 = vector.extract_strided_slice %289 {offsets = [0, 0], sizes = [2, 32], strides = [1, 1]} : vector<2x96xf32> to vector<2x32xf32>
    %292 = arith.addf %290, %291 : vector<2x32xf32>
    %293 = arith.negf %292 : vector<2x32xf32>
    %294 = math.exp %293 : vector<2x32xf32>
    %cst_50 = arith.constant 1.000000e+00 : f32
    %295 = vector.broadcast %cst_50 : f32 to vector<2x32xf32>
    %296 = arith.addf %295, %294 : vector<2x32xf32>
    %297 = arith.divf %295, %296 : vector<2x32xf32>
    %298 = vector.extract_strided_slice %288 {offsets = [0, 32], sizes = [2, 32], strides = [1, 1]} : vector<2x96xf32> to vector<2x32xf32>
    %299 = vector.extract_strided_slice %289 {offsets = [0, 32], sizes = [2, 32], strides = [1, 1]} : vector<2x96xf32> to vector<2x32xf32>
    %300 = arith.addf %298, %299 : vector<2x32xf32>
    %301 = arith.negf %300 : vector<2x32xf32>
    %302 = math.exp %301 : vector<2x32xf32>
    %cst_51 = arith.constant 1.000000e+00 : f32
    %303 = vector.broadcast %cst_51 : f32 to vector<2x32xf32>
    %304 = arith.addf %303, %302 : vector<2x32xf32>
    %305 = arith.divf %303, %304 : vector<2x32xf32>
    %306 = vector.extract_strided_slice %288 {offsets = [0, 64], sizes = [2, 32], strides = [1, 1]} : vector<2x96xf32> to vector<2x32xf32>
    %307 = vector.extract_strided_slice %289 {offsets = [0, 64], sizes = [2, 32], strides = [1, 1]} : vector<2x96xf32> to vector<2x32xf32>
    %308 = arith.mulf %297, %307 : vector<2x32xf32>
    %309 = arith.addf %306, %308 : vector<2x32xf32>
    %310 = math.tanh %309 : vector<2x32xf32>
    %311 = arith.subf %256, %310 : vector<2x32xf32>
    %312 = arith.mulf %305, %311 : vector<2x32xf32>
    %313 = arith.addf %310, %312 : vector<2x32xf32>
    %314 = arith.mulf %313, %24 : vector<2x32xf32>
    %cst_52 = arith.constant dense<0.000000e+00> : vector<2xf32>
    %315 = vector.multi_reduction <add>, %314, %cst_52 [1] : vector<2x32xf32> to vector<2xf32>
    %316 = vector.shape_cast %315 : vector<2xf32> to vector<2x1xf32>
    %317 = vector.extract_strided_slice %22 {offsets = [10, 0], sizes = [2, 96], strides = [1, 1]} : vector<16x96xf32> to vector<2x96xf32>
    %318 = vector.extract_strided_slice %317 {offsets = [0, 0], sizes = [2, 32], strides = [1, 1]} : vector<2x96xf32> to vector<2x32xf32>
    %319 = vector.extract_strided_slice %287 {offsets = [0, 0], sizes = [2, 32], strides = [1, 1]} : vector<2x96xf32> to vector<2x32xf32>
    %320 = arith.addf %318, %319 : vector<2x32xf32>
    %321 = arith.negf %320 : vector<2x32xf32>
    %322 = math.exp %321 : vector<2x32xf32>
    %cst_53 = arith.constant 1.000000e+00 : f32
    %323 = vector.broadcast %cst_53 : f32 to vector<2x32xf32>
    %324 = arith.addf %323, %322 : vector<2x32xf32>
    %325 = arith.divf %323, %324 : vector<2x32xf32>
    %326 = vector.extract_strided_slice %317 {offsets = [0, 32], sizes = [2, 32], strides = [1, 1]} : vector<2x96xf32> to vector<2x32xf32>
    %327 = vector.extract_strided_slice %287 {offsets = [0, 32], sizes = [2, 32], strides = [1, 1]} : vector<2x96xf32> to vector<2x32xf32>
    %328 = arith.addf %326, %327 : vector<2x32xf32>
    %329 = arith.negf %328 : vector<2x32xf32>
    %330 = math.exp %329 : vector<2x32xf32>
    %cst_54 = arith.constant 1.000000e+00 : f32
    %331 = vector.broadcast %cst_54 : f32 to vector<2x32xf32>
    %332 = arith.addf %331, %330 : vector<2x32xf32>
    %333 = arith.divf %331, %332 : vector<2x32xf32>
    %334 = vector.extract_strided_slice %317 {offsets = [0, 64], sizes = [2, 32], strides = [1, 1]} : vector<2x96xf32> to vector<2x32xf32>
    %335 = vector.extract_strided_slice %287 {offsets = [0, 64], sizes = [2, 32], strides = [1, 1]} : vector<2x96xf32> to vector<2x32xf32>
    %336 = arith.mulf %325, %335 : vector<2x32xf32>
    %337 = arith.addf %334, %336 : vector<2x32xf32>
    %338 = math.tanh %337 : vector<2x32xf32>
    %339 = arith.subf %284, %338 : vector<2x32xf32>
    %340 = arith.mulf %333, %339 : vector<2x32xf32>
    %341 = arith.addf %338, %340 : vector<2x32xf32>
    %342 = tpu.concatenate %341, %313, %26 in 1 : vector<2x32xf32>, vector<2x32xf32>, vector<2x1xf32> -> vector<2x65xf32>
    %cst_55 = arith.constant dense<0.000000e+00> : vector<2x384xf32>
    %343 = tpu.matmul %342, %23, %cst_55 {dimension_numbers = #tpu.dot_dimension_numbers<[1], [0], [0], [1], [0, 0, 1, 1], [], []>} : vector<2x65xf32>, vector<65x384xf32>, vector<2x384xf32> -> vector<2x384xf32>
    %344 = vector.extract_strided_slice %343 {offsets = [0, 0], sizes = [2, 96], strides = [1, 1]} : vector<2x384xf32> to vector<2x96xf32>
    %345 = vector.extract_strided_slice %343 {offsets = [0, 128], sizes = [2, 96], strides = [1, 1]} : vector<2x384xf32> to vector<2x96xf32>
    %346 = vector.extract_strided_slice %343 {offsets = [0, 256], sizes = [2, 96], strides = [1, 1]} : vector<2x384xf32> to vector<2x96xf32>
    %347 = vector.extract_strided_slice %345 {offsets = [0, 0], sizes = [2, 32], strides = [1, 1]} : vector<2x96xf32> to vector<2x32xf32>
    %348 = vector.extract_strided_slice %346 {offsets = [0, 0], sizes = [2, 32], strides = [1, 1]} : vector<2x96xf32> to vector<2x32xf32>
    %349 = arith.addf %347, %348 : vector<2x32xf32>
    %350 = arith.negf %349 : vector<2x32xf32>
    %351 = math.exp %350 : vector<2x32xf32>
    %cst_56 = arith.constant 1.000000e+00 : f32
    %352 = vector.broadcast %cst_56 : f32 to vector<2x32xf32>
    %353 = arith.addf %352, %351 : vector<2x32xf32>
    %354 = arith.divf %352, %353 : vector<2x32xf32>
    %355 = vector.extract_strided_slice %345 {offsets = [0, 32], sizes = [2, 32], strides = [1, 1]} : vector<2x96xf32> to vector<2x32xf32>
    %356 = vector.extract_strided_slice %346 {offsets = [0, 32], sizes = [2, 32], strides = [1, 1]} : vector<2x96xf32> to vector<2x32xf32>
    %357 = arith.addf %355, %356 : vector<2x32xf32>
    %358 = arith.negf %357 : vector<2x32xf32>
    %359 = math.exp %358 : vector<2x32xf32>
    %cst_57 = arith.constant 1.000000e+00 : f32
    %360 = vector.broadcast %cst_57 : f32 to vector<2x32xf32>
    %361 = arith.addf %360, %359 : vector<2x32xf32>
    %362 = arith.divf %360, %361 : vector<2x32xf32>
    %363 = vector.extract_strided_slice %345 {offsets = [0, 64], sizes = [2, 32], strides = [1, 1]} : vector<2x96xf32> to vector<2x32xf32>
    %364 = vector.extract_strided_slice %346 {offsets = [0, 64], sizes = [2, 32], strides = [1, 1]} : vector<2x96xf32> to vector<2x32xf32>
    %365 = arith.mulf %354, %364 : vector<2x32xf32>
    %366 = arith.addf %363, %365 : vector<2x32xf32>
    %367 = math.tanh %366 : vector<2x32xf32>
    %368 = arith.subf %313, %367 : vector<2x32xf32>
    %369 = arith.mulf %362, %368 : vector<2x32xf32>
    %370 = arith.addf %367, %369 : vector<2x32xf32>
    %371 = arith.mulf %370, %24 : vector<2x32xf32>
    %cst_58 = arith.constant dense<0.000000e+00> : vector<2xf32>
    %372 = vector.multi_reduction <add>, %371, %cst_58 [1] : vector<2x32xf32> to vector<2xf32>
    %373 = vector.shape_cast %372 : vector<2xf32> to vector<2x1xf32>
    %374 = vector.extract_strided_slice %22 {offsets = [12, 0], sizes = [2, 96], strides = [1, 1]} : vector<16x96xf32> to vector<2x96xf32>
    %375 = vector.extract_strided_slice %374 {offsets = [0, 0], sizes = [2, 32], strides = [1, 1]} : vector<2x96xf32> to vector<2x32xf32>
    %376 = vector.extract_strided_slice %344 {offsets = [0, 0], sizes = [2, 32], strides = [1, 1]} : vector<2x96xf32> to vector<2x32xf32>
    %377 = arith.addf %375, %376 : vector<2x32xf32>
    %378 = arith.negf %377 : vector<2x32xf32>
    %379 = math.exp %378 : vector<2x32xf32>
    %cst_59 = arith.constant 1.000000e+00 : f32
    %380 = vector.broadcast %cst_59 : f32 to vector<2x32xf32>
    %381 = arith.addf %380, %379 : vector<2x32xf32>
    %382 = arith.divf %380, %381 : vector<2x32xf32>
    %383 = vector.extract_strided_slice %374 {offsets = [0, 32], sizes = [2, 32], strides = [1, 1]} : vector<2x96xf32> to vector<2x32xf32>
    %384 = vector.extract_strided_slice %344 {offsets = [0, 32], sizes = [2, 32], strides = [1, 1]} : vector<2x96xf32> to vector<2x32xf32>
    %385 = arith.addf %383, %384 : vector<2x32xf32>
    %386 = arith.negf %385 : vector<2x32xf32>
    %387 = math.exp %386 : vector<2x32xf32>
    %cst_60 = arith.constant 1.000000e+00 : f32
    %388 = vector.broadcast %cst_60 : f32 to vector<2x32xf32>
    %389 = arith.addf %388, %387 : vector<2x32xf32>
    %390 = arith.divf %388, %389 : vector<2x32xf32>
    %391 = vector.extract_strided_slice %374 {offsets = [0, 64], sizes = [2, 32], strides = [1, 1]} : vector<2x96xf32> to vector<2x32xf32>
    %392 = vector.extract_strided_slice %344 {offsets = [0, 64], sizes = [2, 32], strides = [1, 1]} : vector<2x96xf32> to vector<2x32xf32>
    %393 = arith.mulf %382, %392 : vector<2x32xf32>
    %394 = arith.addf %391, %393 : vector<2x32xf32>
    %395 = math.tanh %394 : vector<2x32xf32>
    %396 = arith.subf %341, %395 : vector<2x32xf32>
    %397 = arith.mulf %390, %396 : vector<2x32xf32>
    %398 = arith.addf %395, %397 : vector<2x32xf32>
    %399 = tpu.concatenate %398, %370, %26 in 1 : vector<2x32xf32>, vector<2x32xf32>, vector<2x1xf32> -> vector<2x65xf32>
    %cst_61 = arith.constant dense<0.000000e+00> : vector<2x384xf32>
    %400 = tpu.matmul %399, %23, %cst_61 {dimension_numbers = #tpu.dot_dimension_numbers<[1], [0], [0], [1], [0, 0, 1, 1], [], []>} : vector<2x65xf32>, vector<65x384xf32>, vector<2x384xf32> -> vector<2x384xf32>
    %401 = vector.extract_strided_slice %400 {offsets = [0, 0], sizes = [2, 96], strides = [1, 1]} : vector<2x384xf32> to vector<2x96xf32>
    %402 = vector.extract_strided_slice %400 {offsets = [0, 128], sizes = [2, 96], strides = [1, 1]} : vector<2x384xf32> to vector<2x96xf32>
    %403 = vector.extract_strided_slice %400 {offsets = [0, 256], sizes = [2, 96], strides = [1, 1]} : vector<2x384xf32> to vector<2x96xf32>
    %404 = vector.extract_strided_slice %402 {offsets = [0, 0], sizes = [2, 32], strides = [1, 1]} : vector<2x96xf32> to vector<2x32xf32>
    %405 = vector.extract_strided_slice %403 {offsets = [0, 0], sizes = [2, 32], strides = [1, 1]} : vector<2x96xf32> to vector<2x32xf32>
    %406 = arith.addf %404, %405 : vector<2x32xf32>
    %407 = arith.negf %406 : vector<2x32xf32>
    %408 = math.exp %407 : vector<2x32xf32>
    %cst_62 = arith.constant 1.000000e+00 : f32
    %409 = vector.broadcast %cst_62 : f32 to vector<2x32xf32>
    %410 = arith.addf %409, %408 : vector<2x32xf32>
    %411 = arith.divf %409, %410 : vector<2x32xf32>
    %412 = vector.extract_strided_slice %402 {offsets = [0, 32], sizes = [2, 32], strides = [1, 1]} : vector<2x96xf32> to vector<2x32xf32>
    %413 = vector.extract_strided_slice %403 {offsets = [0, 32], sizes = [2, 32], strides = [1, 1]} : vector<2x96xf32> to vector<2x32xf32>
    %414 = arith.addf %412, %413 : vector<2x32xf32>
    %415 = arith.negf %414 : vector<2x32xf32>
    %416 = math.exp %415 : vector<2x32xf32>
    %cst_63 = arith.constant 1.000000e+00 : f32
    %417 = vector.broadcast %cst_63 : f32 to vector<2x32xf32>
    %418 = arith.addf %417, %416 : vector<2x32xf32>
    %419 = arith.divf %417, %418 : vector<2x32xf32>
    %420 = vector.extract_strided_slice %402 {offsets = [0, 64], sizes = [2, 32], strides = [1, 1]} : vector<2x96xf32> to vector<2x32xf32>
    %421 = vector.extract_strided_slice %403 {offsets = [0, 64], sizes = [2, 32], strides = [1, 1]} : vector<2x96xf32> to vector<2x32xf32>
    %422 = arith.mulf %411, %421 : vector<2x32xf32>
    %423 = arith.addf %420, %422 : vector<2x32xf32>
    %424 = math.tanh %423 : vector<2x32xf32>
    %425 = arith.subf %370, %424 : vector<2x32xf32>
    %426 = arith.mulf %419, %425 : vector<2x32xf32>
    %427 = arith.addf %424, %426 : vector<2x32xf32>
    %428 = arith.mulf %427, %24 : vector<2x32xf32>
    %cst_64 = arith.constant dense<0.000000e+00> : vector<2xf32>
    %429 = vector.multi_reduction <add>, %428, %cst_64 [1] : vector<2x32xf32> to vector<2xf32>
    %430 = vector.shape_cast %429 : vector<2xf32> to vector<2x1xf32>
    %431 = vector.extract_strided_slice %22 {offsets = [14, 0], sizes = [2, 96], strides = [1, 1]} : vector<16x96xf32> to vector<2x96xf32>
    %432 = vector.extract_strided_slice %431 {offsets = [0, 0], sizes = [2, 32], strides = [1, 1]} : vector<2x96xf32> to vector<2x32xf32>
    %433 = vector.extract_strided_slice %401 {offsets = [0, 0], sizes = [2, 32], strides = [1, 1]} : vector<2x96xf32> to vector<2x32xf32>
    %434 = arith.addf %432, %433 : vector<2x32xf32>
    %435 = arith.negf %434 : vector<2x32xf32>
    %436 = math.exp %435 : vector<2x32xf32>
    %cst_65 = arith.constant 1.000000e+00 : f32
    %437 = vector.broadcast %cst_65 : f32 to vector<2x32xf32>
    %438 = arith.addf %437, %436 : vector<2x32xf32>
    %439 = arith.divf %437, %438 : vector<2x32xf32>
    %440 = vector.extract_strided_slice %431 {offsets = [0, 32], sizes = [2, 32], strides = [1, 1]} : vector<2x96xf32> to vector<2x32xf32>
    %441 = vector.extract_strided_slice %401 {offsets = [0, 32], sizes = [2, 32], strides = [1, 1]} : vector<2x96xf32> to vector<2x32xf32>
    %442 = arith.addf %440, %441 : vector<2x32xf32>
    %443 = arith.negf %442 : vector<2x32xf32>
    %444 = math.exp %443 : vector<2x32xf32>
    %cst_66 = arith.constant 1.000000e+00 : f32
    %445 = vector.broadcast %cst_66 : f32 to vector<2x32xf32>
    %446 = arith.addf %445, %444 : vector<2x32xf32>
    %447 = arith.divf %445, %446 : vector<2x32xf32>
    %448 = vector.extract_strided_slice %431 {offsets = [0, 64], sizes = [2, 32], strides = [1, 1]} : vector<2x96xf32> to vector<2x32xf32>
    %449 = vector.extract_strided_slice %401 {offsets = [0, 64], sizes = [2, 32], strides = [1, 1]} : vector<2x96xf32> to vector<2x32xf32>
    %450 = arith.mulf %439, %449 : vector<2x32xf32>
    %451 = arith.addf %448, %450 : vector<2x32xf32>
    %452 = math.tanh %451 : vector<2x32xf32>
    %453 = arith.subf %398, %452 : vector<2x32xf32>
    %454 = arith.mulf %447, %453 : vector<2x32xf32>
    %455 = arith.addf %452, %454 : vector<2x32xf32>
    %456 = tpu.concatenate %455, %427, %26 in 1 : vector<2x32xf32>, vector<2x32xf32>, vector<2x1xf32> -> vector<2x65xf32>
    %cst_67 = arith.constant dense<0.000000e+00> : vector<2x384xf32>
    %457 = tpu.matmul %456, %23, %cst_67 {dimension_numbers = #tpu.dot_dimension_numbers<[1], [0], [0], [1], [0, 0, 1, 1], [], []>} : vector<2x65xf32>, vector<65x384xf32>, vector<2x384xf32> -> vector<2x384xf32>
    %458 = vector.extract_strided_slice %457 {offsets = [0, 128], sizes = [2, 96], strides = [1, 1]} : vector<2x384xf32> to vector<2x96xf32>
    %459 = vector.extract_strided_slice %457 {offsets = [0, 256], sizes = [2, 96], strides = [1, 1]} : vector<2x384xf32> to vector<2x96xf32>
    %460 = vector.extract_strided_slice %458 {offsets = [0, 0], sizes = [2, 32], strides = [1, 1]} : vector<2x96xf32> to vector<2x32xf32>
    %461 = vector.extract_strided_slice %459 {offsets = [0, 0], sizes = [2, 32], strides = [1, 1]} : vector<2x96xf32> to vector<2x32xf32>
    %462 = arith.addf %460, %461 : vector<2x32xf32>
    %463 = arith.negf %462 : vector<2x32xf32>
    %464 = math.exp %463 : vector<2x32xf32>
    %cst_68 = arith.constant 1.000000e+00 : f32
    %465 = vector.broadcast %cst_68 : f32 to vector<2x32xf32>
    %466 = arith.addf %465, %464 : vector<2x32xf32>
    %467 = arith.divf %465, %466 : vector<2x32xf32>
    %468 = vector.extract_strided_slice %458 {offsets = [0, 32], sizes = [2, 32], strides = [1, 1]} : vector<2x96xf32> to vector<2x32xf32>
    %469 = vector.extract_strided_slice %459 {offsets = [0, 32], sizes = [2, 32], strides = [1, 1]} : vector<2x96xf32> to vector<2x32xf32>
    %470 = arith.addf %468, %469 : vector<2x32xf32>
    %471 = arith.negf %470 : vector<2x32xf32>
    %472 = math.exp %471 : vector<2x32xf32>
    %cst_69 = arith.constant 1.000000e+00 : f32
    %473 = vector.broadcast %cst_69 : f32 to vector<2x32xf32>
    %474 = arith.addf %473, %472 : vector<2x32xf32>
    %475 = arith.divf %473, %474 : vector<2x32xf32>
    %476 = vector.extract_strided_slice %458 {offsets = [0, 64], sizes = [2, 32], strides = [1, 1]} : vector<2x96xf32> to vector<2x32xf32>
    %477 = vector.extract_strided_slice %459 {offsets = [0, 64], sizes = [2, 32], strides = [1, 1]} : vector<2x96xf32> to vector<2x32xf32>
    %478 = arith.mulf %467, %477 : vector<2x32xf32>
    %479 = arith.addf %476, %478 : vector<2x32xf32>
    %480 = math.tanh %479 : vector<2x32xf32>
    %481 = arith.subf %427, %480 : vector<2x32xf32>
    %482 = arith.mulf %475, %481 : vector<2x32xf32>
    %483 = arith.addf %480, %482 : vector<2x32xf32>
    %484 = arith.mulf %483, %24 : vector<2x32xf32>
    %cst_70 = arith.constant dense<0.000000e+00> : vector<2xf32>
    %485 = vector.multi_reduction <add>, %484, %cst_70 [1] : vector<2x32xf32> to vector<2xf32>
    %486 = vector.shape_cast %485 : vector<2xf32> to vector<2x1xf32>
    %487 = tpu.concatenate %88, %145, %202, %259, %316, %373, %430, %486 in 1 : vector<2x1xf32>, vector<2x1xf32>, vector<2x1xf32>, vector<2x1xf32>, vector<2x1xf32>, vector<2x1xf32>, vector<2x1xf32>, vector<2x1xf32> -> vector<2x8xf32>
    %488 = arith.addf %487, %25 : vector<2x8xf32>
    %489 = tpu.concatenate %18, %488 in 1 : vector<2x72xf32>, vector<2x8xf32> -> vector<2x80xf32>
    %c0_71 = arith.constant 0 : index
    %c0_72 = arith.constant 0 : index
    %490 = vector.load %arg5[%c0_71, %c0_72] : memref<2x80xf32, #tpu.memory_space<vmem>>, vector<2x80xf32>
    tpu.vector_store %arg5[%c0_71, %c0_72], %489 {strides = array<i32>} : memref<2x80xf32, #tpu.memory_space<vmem>>, vector<2x80xf32>,
    return
  }
}

</mosaic_0001>

<bundles_post_ra>
// kernel: tgcn_forward.1
= control target key start
LH: loop header
LB: loop body
LE: loop exit
PB: predicated region body
PF: predicated region fallthrough
CT: control target
= control target key end

     0   :  { %vm55_vm0 = vcmask 1040384   ;;  %v2921_v3 = vmov 0.0   ;;  %vm48_vm1 = vcmask 793600   ;;  %vm189_vm2 = vcmask 523264   ;;  %s2924_s29 = smov 64   ;;  %s2925_s24 = smov 96   ;;  %s4047_s1 = inlined_call_operand.vmem [shape: f32[97,192], index: 1, kind: input, shape index: {}]   ;;  %s4048_s2 = inlined_call_operand.vmem [shape: f32[192,72], index: 2, kind: input, shape index: {}]   ;;  %s4049_s0 = inlined_call_operand.vmem [shape: f32[16,97], index: 0, kind: input, shape index: {}]   ;;  %s4050_s3 = inlined_call_operand.vmem [shape: f32[65,384], index: 3, kind: input, shape index: {}]   ;;  %s4051_s4 = inlined_call_operand.vmem [shape: f32[128,96], index: 4, kind: input, shape index: {}]   ;;  %s4052_s5 = inlined_call_operand.vmem [shape: f32[2,80], index: 5, kind: output, shape index: {}]  }
   0x1   :  { %v47_v0 = vld [vmem:[%s4047_s1 + $0xc8] sm:$0x1]  ;;  %v46_v1 = vld [vmem:[%s4047_s1 + $0xc0] sm:$0x1]  ;;  %v45_v2 = vld [vmem:[%s4047_s1 + $0xb8] sm:$0xff]  ;;  %126 = vmatprep.mubr.f32.mxu0 %v2921_v3  ;;  %196 = vmatprep.subr.mxu1 %v2921_v3  ;;  %vm481_vm3 = vcmask 531456  }
   0x2   :  { %2403 = vmatprep.subr.msk.mxu0 %vm55_vm0, %v47_v0  ;;  %v44_v4 = vld [vmem:[%s4047_s1 + $0xb0] sm:$0xff]  ;;  %v43_v5 = vld [vmem:[%s4047_s1 + $0xa8] sm:$0xff]  ;;  %v42_v6 = vld [vmem:[%s4047_s1 + $0xa0] sm:$0xff]  ;;  %vm2923_vm4 = vmmov 0   ;;  %vm284_vm5 = vcmask 130048   ;;  %vm369_vm6 = vcmask 588800  }
   0x3   :  { %2404 = vmatpush1.msk.msra.mxu0 %vm55_vm0, %v46_v1  ;;  %v41_v7 = vld [vmem:[%s4047_s1 + $0x98] sm:$0xff]  ;;  %v40_v8 = vld [vmem:[%s4047_s1 + $0x90] sm:$0xff]  ;;  %v39_v9 = vld [vmem:[%s4047_s1 + $0x88] sm:$0xff]  ;;  %s2926_s14 = smov 32   ;;  %vm594_vm7 = vcmask 261120   ;;  %vm782_vm8 = vcmask 254976  }
   0x4   :  { %70 = vmatprep.subr.mxu0 %v45_v2  ;;  %v38_v10 = vld [vmem:[%s4047_s1 + $0x80] sm:$0xff]  ;;  %v37_v11 = vld [vmem:[%s4047_s1 + $0x78] sm:$0xff]  ;;  %v36_v12 = vld [vmem:[%s4047_s1 + $0x70] sm:$0xff]  ;;  %vm2377_vm9 = vcmask 7168   ;;  %vm2379_vm10 = vcmask 15360   ;;  %vm2381_vm11 = vcmask 23552  }
   0x5   :  { %71 = vmatpush1.msra.mxu0 %v44_v4  ;;  %v180_v13 = vld [vmem:[%s4048_s2 + $0x78] sm:$0xff]  ;;  %v179_v14 = vld [vmem:[%s4048_s2 + $0x70] sm:$0xff]  ;;  %v35_v15 = vld [vmem:[%s4047_s1 + $0x68] sm:$0xff]  ;;  %vm2383_vm12 = vcmask 31744   ;;  %vm2385_vm13 = vcmask 39936   ;;  %vm2387_vm14 = vcmask 48128  }
   0x6   :  { %72 = vmatprep.subr.mxu0 %v43_v5  ;;  %197 = vmatpush1.msra.mxu1 %v180_v13  ;;  %v34_v16 = vld [vmem:[%s4047_s1 + $0x60] sm:$0xff]  ;;  %v178_v17 = vld [vmem:[%s4048_s2 + $0x68] sm:$0xff]  ;;  %v33_v18 = vld [vmem:[%s4047_s1 + $0x58] sm:$0xff]  ;;  %vm2389_vm15 = vcmask 56320  }
   0x7   :  { %73 = vmatpush1.msra.mxu0 %v42_v6  ;;  %198 = vmatprep.subr.mxu1 %v2921_v3  ;;  %v32_v19 = vld [vmem:[%s4047_s1 + $0x50] sm:$0xff]  ;;  %v177_v20 = vld [vmem:[%s4048_s2 + $0x60] sm:$0xff]  ;;  %v31_v21 = vld [vmem:[%s4047_s1 + $0x48] sm:$0xff] }
   0x8   :  { %74 = vmatprep.subr.mxu0 %v41_v7  ;;  %199 = vmatpush1.msra.mxu1 %v179_v14  ;;  %v30_v22 = vld [vmem:[%s4047_s1 + $0x40] sm:$0xff]  ;;  %v176_v23 = vld [vmem:[%s4048_s2 + $0x58] sm:$0xff]  ;;  %v28_v25 = vld [vmem:[%s4047_s1 + $0x30] sm:$0xff] }
   0x9   :  { %75 = vmatpush1.msra.mxu0 %v40_v8  ;;  %200 = vmatprep.subr.mxu1 %v2921_v3  ;;  %v29_v24 = vld [vmem:[%s4047_s1 + $0x38] sm:$0xff]  ;;  %v175_v26 = vld [vmem:[%s4048_s2 + $0x50] sm:$0xff]  ;;  %v27_v27 = vld [vmem:[%s4047_s1 + $0x28] sm:$0xff] }
   0xa   :  { %76 = vmatprep.subr.mxu0 %v39_v9  ;;  %201 = vmatpush1.msra.mxu1 %v178_v17  ;;  %v26_v28 = vld [vmem:[%s4047_s1 + $0x20] sm:$0xff]  ;;  %v25_v29 = vld [vmem:[%s4047_s1 + $0x18] sm:$0xff]  ;;  %v24_v30 = vld [vmem:[%s4047_s1 + $0x10] sm:$0xff] }
   0xb   :  { %77 = vmatpush1.msra.mxu0 %v38_v10  ;;  %202 = vmatprep.subr.mxu1 %v2921_v3  ;;  %v23_v31 = vld [vmem:[%s4047_s1 + $0x8] sm:$0xff]  ;;  %v22_v32 = vld [vmem:[%s4047_s1] sm:$0xff]  ;;  %v172_v37 = vld [vmem:[%s4048_s2 + $0x38] sm:$0xff] }
   0xc   :  { %78 = vmatprep.subr.mxu0 %v37_v11  ;;  %203 = vmatpush1.msra.mxu1 %v177_v20  ;;  %v20_v33 = vld [vmem:[%s4049_s0] sm:$0xff]  ;;  %v21_v34 = vld [vmem:[%s4049_s0 + $0x8] sm:$0xff]  ;;  %v171_v38 = vld [vmem:[%s4048_s2 + $0x30] sm:$0xff] }
   0xd   :  { %79 = vmatpush1.msra.mxu0 %v36_v12  ;;  %204 = vmatprep.subr.mxu1 %v2921_v3  ;;  %v174_v35 = vld [vmem:[%s4048_s2 + $0x48] sm:$0xff]  ;;  %v173_v36 = vld [vmem:[%s4048_s2 + $0x40] sm:$0xff]  ;;  %v168_v41 = vld [vmem:[%s4048_s2 + $0x18] sm:$0xff] }
   0xe   :  { %80 = vmatprep.subr.mxu0 %v35_v15  ;;  %205 = vmatpush1.msra.mxu1 %v176_v23  ;;  %v170_v39 = vld [vmem:[%s4048_s2 + $0x28] sm:$0xff]  ;;  %v169_v40 = vld [vmem:[%s4048_s2 + $0x20] sm:$0xff]  ;;  %v167_v42 = vld [vmem:[%s4048_s2 + $0x10] sm:$0xff] }
   0xf   :  { %81 = vmatpush1.msra.mxu0 %v34_v16  ;;  %206 = vmatprep.subr.mxu1 %v2921_v3  ;;  %v166_v43 = vld [vmem:[%s4048_s2 + $0x8] sm:$0xff]  ;;  %v165_v44 = vld [vmem:[%s4048_s2] sm:$0xff]  ;;  %v188_v45 = vld [vmem:[%s4048_s2 + $0xb8] sm:$0xff] }
  0x10   :  { %82 = vmatprep.subr.mxu0 %v33_v18  ;;  %207 = vmatpush1.msra.mxu1 %v175_v26  ;;  %v187_v46 = vld [vmem:[%s4048_s2 + $0xb0] sm:$0xff]  ;;  %v186_v47 = vld [vmem:[%s4048_s2 + $0xa8] sm:$0xff]  ;;  %v185_v48 = vld [vmem:[%s4048_s2 + $0xa0] sm:$0xff] }
  0x11   :  { %83 = vmatpush1.msra.mxu0 %v32_v19  ;;  %208 = vmatprep.subr.mxu1 %v2921_v3  ;;  %v184_v49 = vld [vmem:[%s4048_s2 + $0x98] sm:$0xff]  ;;  %v183_v50 = vld [vmem:[%s4048_s2 + $0x90] sm:$0xff]  ;;  %v182_v51 = vld [vmem:[%s4048_s2 + $0x88] sm:$0xff] }
  0x12   :  { %84 = vmatprep.subr.mxu0 %v31_v21  ;;  %209 = vmatpush1.msra.mxu1 %v174_v35  ;;  %v181_v52 = vld [vmem:[%s4048_s2 + $0x80] sm:$0xff]  ;;  %v3146_v53 = vld [vmem:[%s4050_s3 + $0xc8] sm:$0x1]  ;;  %v3159_v10 = vld [vmem:[%s4050_s3 + $0xb0] sm:$0xff] }
  0x13   :  { %85 = vmatpush1.msra.mxu0 %v30_v22  ;;  %210 = vmatprep.subr.mxu1 %v2921_v3  ;;  %v3153_v8 = vld [vmem:[%s4050_s3 + $0xc0] sm:$0x1]  ;;  %v3164_v11 = vld [vmem:[%s4050_s3 + $0xa8] sm:$0xff]  ;;  %v3171_v12 = vld [vmem:[%s4050_s3 + $0x98] sm:$0xff] }
  0x14   :  { %86 = vmatprep.subr.mxu0 %v29_v24  ;;  %211 = vmatpush1.msra.mxu1 %v173_v36  ;;  %v3177_v14 = vld [vmem:[%s4050_s3 + $0x90] sm:$0xff]  ;;  %v3184_v16 = vld [vmem:[%s4050_s3 + $0x80] sm:$0xff]  ;;  %v3190_v17 = vld [vmem:[%s4050_s3 + $0x78] sm:$0xff] }
  0x15   :  { %87 = vmatpush1.msra.mxu0 %v28_v25  ;;  %212 = vmatprep.subr.mxu1 %v2921_v3  ;;  %v3196_v18 = vld [vmem:[%s4050_s3 + $0x68] sm:$0xff]  ;;  %v3203_v19 = vld [vmem:[%s4050_s3 + $0x60] sm:$0xff]  ;;  %v3209_v20 = vld [vmem:[%s4050_s3 + $0x50] sm:$0xff] }
  0x16   :  { %88 = vmatprep.subr.mxu0 %v27_v27  ;;  %213 = vmatpush1.msra.mxu1 %v172_v37  ;;  %v3215_v21 = vld [vmem:[%s4050_s3 + $0x48] sm:$0xff]  ;;  %v3221_v22 = vld [vmem:[%s4050_s3 + $0x38] sm:$0xff]  ;;  %v3227_v23 = vld [vmem:[%s4050_s3 + $0x30] sm:$0xff] }
  0x17   :  { %89 = vmatpush1.msra.mxu0 %v26_v28  ;;  %214 = vmatprep.subr.mxu1 %v2921_v3  ;;  %v3233_v24 = vld [vmem:[%s4050_s3 + $0x20] sm:$0xff]  ;;  %v3239_v25 = vld [vmem:[%s4050_s3 + $0x18] sm:$0xff]  ;;  %v3245_v26 = vld [vmem:[%s4050_s3 + $0x8] sm:$0xff]  ;;  %v2922_v28 = vmov 1.0  }
  0x18   :  { %90 = vmatprep.subr.mxu0 %v25_v29  ;;  %215 = vmatpush1.msra.mxu1 %v171_v38  ;;  %v3251_v27 = vld [vmem:[%s4050_s3] sm:$0xff]  ;;  %v480_v29 = vsel %vm189_vm2, 0.0, %v2922_v28 }
  0x19   :  { %91 = vmatpush1.msra.mxu0 %v24_v30  ;;  %216 = vmatprep.subr.mxu1 %v2921_v3  ;;  %v163_v30 = vld [vmem:[%s4051_s4 + $0x10] sm:$0xff] }
  0x1a   :  { %92 = vmatprep.subr.mxu0 %v23_v31  ;;  %217 = vmatpush1.msra.mxu1 %v170_v39 }
  0x1b   :  { %93 = vmatpush1.msra.mxu0 %v22_v32  ;;  %218 = vmatprep.subr.mxu1 %v2921_v3 }
  0x1c   :  { %2405 = vmatmul.mubr.msk.f32.vlgmr.msra.gmra.mxu0 %vm48_vm1, %v20_v33  ;;  %2571 = vmatprep.subr.mxu0 %v2921_v3 }
  0x1d   :  { %132 = vmatprep.mubr.f32.mxu0 %v2921_v3  ;;  %219 = vmatpush1.msra.mxu1 %v169_v40 }
  0x1e   :  { %220 = vmatprep.subr.mxu1 %v2921_v3 }
  0x1f   :  { %221 = vmatpush1.msra.mxu1 %v168_v41 }
  0x20   :  { %2406 = vmatmul.mubr.msk.f32.gmra.mxu0 %vm48_vm1, %v21_v34  ;;  %222 = vmatprep.subr.mxu1 %v2921_v3  ;;  %v164_v34 = vld [vmem:[%s4051_s4 + $0x18] sm:$0xff] }
  0x21   :  { %223 = vmatpush1.msra.mxu1 %v167_v42  ;;  %2575 = vmatprep.mubr.msk.f32.mxu0 %vm2923_vm4, %v2921_v3 }
  0x22   :  { %224 = vmatprep.subr.mxu1 %v2921_v3 }
  0x23   :  { %225 = vmatpush1.msra.mxu1 %v166_v43 }
  0x24   :  { %226 = vmatprep.subr.mxu1 %v2921_v3 }
  0x25   :  { %227 = vmatpush1.msra.mxu1 %v165_v44 }
  0x26   :  { %244 = vmatprep.subr.mxu1 %v2921_v3 }
  0x27   :  { %245 = vmatpush2.msra.mxu1 %v188_v45 }
  0x28   :  { %246 = vmatprep.subr.mxu1 %v2921_v3 }
  0x29   :  { %247 = vmatpush2.msra.mxu1 %v187_v46 }
  0x2a   :  { %248 = vmatprep.subr.mxu1 %v2921_v3 }
  0x2b   :  { %249 = vmatpush2.msra.mxu1 %v186_v47  ;;  %v283_v47 = vld [vmem:[%s4051_s4 + $0x20] sm:$0x3] }
  0x2c   :  { %250 = vmatprep.subr.mxu1 %v2921_v3 }
  0x2d   :  { %251 = vmatpush2.msra.mxu1 %v185_v48  ;;  %v366_v48 = vld [vmem:[%s4051_s4 + $0x78] sm:$0xff] }
  0x2e   :  { %252 = vmatprep.subr.mxu1 %v2921_v3 }
  0x2f   :  { %253 = vmatpush2.msra.mxu1 %v184_v49 }
  0x30   :  { %254 = vmatprep.subr.mxu1 %v2921_v3 }
  0x31   :  { %255 = vmatpush2.msra.mxu1 %v183_v50  ;;  %v365_v50 = vld [vmem:[%s4051_s4 + $0x70] sm:$0xff] }
  0x32   :  { %256 = vmatprep.subr.mxu1 %v2921_v3 }
  0x33   :  { %257 = vmatpush2.msra.mxu1 %v182_v51  ;;  %v364_v51 = vld [vmem:[%s4051_s4 + $0x68] sm:$0xff] }
  0x34   :  { %258 = vmatprep.subr.mxu1 %v2921_v3 }
  0x35   :  { %259 = vmatpush2.msra.mxu1 %v181_v52  ;;  %v363_v52 = vld [vmem:[%s4051_s4 + $0x60] sm:$0xff] }
  0x36   :  { %2418 = vmatprep.subr.msk.mxu1 %vm55_vm0, %v3146_v53 }
  0xdc   :  { %v128_v54 = vpop.f32.mrf.mxu0 }
  0xdd   :  { %v2407_v55 = vmul.f32 -1.442695, %v128_v54  ;;  %v362_v54 = vld [vmem:[%s4051_s4 + $0x58] sm:$0xff] }
  0xde   :  { %v130_v56 = vpop.f32.mrf.mxu0 }
  0xdf   :  { %2774 = vpow2.f32 %v2407_v55  ;;  %v2408_v57 = vmul.f32 -1.442695, %v130_v56  ;;  %v361_v55 = vld [vmem:[%s4051_s4 + $0x50] sm:$0xff]  ;;  %v360_v56 = vld [vmem:[%s4051_s4 + $0x48] sm:$0xff] }
  0xe0   :  { %v134_v58 = vpop.f32.mrf.mxu0 }
  0xe1   :  { %2776 = vpow2.f32 %v2408_v57  ;;  %v2409_v59 = vmul.f32 -1.442695, %v134_v58  ;;  %v359_v57 = vld [vmem:[%s4051_s4 + $0x40] sm:$0xff]  ;;  %v358_v58 = vld [vmem:[%s4051_s4 + $0x38] sm:$0xff] }
  0xe2   :  { %v136_v60 = vpop.f32.mrf.mxu0 }
  0xe3   :  { %2778 = vpow2.f32 %v2409_v59  ;;  %v2410_v61 = vmul.f32 -1.442695, %v136_v60 }
  0xe5   :  { %2780 = vpow2.f32 %v2410_v61 }
  0xec   :  { %v2775_v62 = vpop.eup %2774 }
  0xed   :  { %v151_v0 = vadd.f32 1.0, %v2775_v62  ;;  %v367_v62 = vld [vmem:[%s4051_s4] sm:$0xff] }
  0xee   :  { %v2777_v63 = vpop.eup %2776 }
  0xef   :  { %v152_v1 = vadd.f32 1.0, %v2777_v63 }
  0xf0   :  { %v2779_v2 = vpop.eup %2778 }
  0xf1   :  { %2782 = vrcp.f32 %v152_v1  ;;  %v153_v5 = vadd.f32 1.0, %v2779_v2 }
  0xf2   :  { %v2781_v4 = vpop.eup %2780  ;;  %2784 = vrcp.f32 %v151_v0 }
  0xf3   :  { %v154_v6 = vadd.f32 1.0, %v2781_v4 }
  0xf5   :  { %2786 = vrcp.f32 %v154_v6 }
  0xf6   :  { %2788 = vrcp.f32 %v153_v5 }
  0xfe   :  { %v2783_v7 = vpop.eup %2782 }
  0xff   :  { %v2785_v9 = vpop.eup %2784  ;;  %2411 = vmatprep.mubr.msk.f32.mxu1 %vm189_vm2, %v2783_v7 }
 0x100   :  { %261 = vmatmul.mubr.f32.vlgmr.msra.gmra.mxu1 %v2785_v9 }
 0x101   :  { %2419 = vmatpush1.msk.msra.mxu1 %vm55_vm0, %v3153_v8 }
 0x102   :  { %v2787_v13 = vpop.eup %2786  ;;  %507 = vmatprep.subr.mxu1 %v3159_v10 }
 0x103   :  { %v2789_v15 = vpop.eup %2788  ;;  %2412 = vmatprep.mubr.msk.f32.mxu1 %vm189_vm2, %v2787_v13  ;;  %508 = vmatpush1.msra.mxu1 %v3164_v11 }
 0x104   :  { %266 = vmatmul.mubr.f32.gmra.mxu1 %v2789_v15  ;;  %509 = vmatprep.subr.mxu1 %v3171_v12 }
 0x105   :  { %510 = vmatpush1.msra.mxu1 %v3177_v14  ;;  %555 = vmatprep.mubr.f32.mxu1 %v2921_v3 }
 0x106   :  { %511 = vmatprep.subr.mxu1 %v3184_v16 }
 0x107   :  { %512 = vmatpush1.msra.mxu1 %v3190_v17 }
 0x108   :  { %513 = vmatprep.subr.mxu1 %v3196_v18 }
 0x109   :  { %514 = vmatpush1.msra.mxu1 %v3203_v19 }
 0x10a   :  { %515 = vmatprep.subr.mxu1 %v3209_v20 }
 0x10b   :  { %516 = vmatpush1.msra.mxu1 %v3215_v21 }
 0x10c   :  { %517 = vmatprep.subr.mxu1 %v3221_v22 }
 0x10d   :  { %518 = vmatpush1.msra.mxu1 %v3227_v23 }
 0x10e   :  { %519 = vmatprep.subr.mxu1 %v3233_v24 }
 0x10f   :  { %520 = vmatpush1.msra.mxu1 %v3239_v25 }
 0x110   :  { %521 = vmatprep.subr.mxu1 %v3245_v26 }
 0x111   :  { %522 = vmatpush1.msra.mxu1 %v3251_v27 }
 0x112   :  { %2420 = vmatmul.mubr.msk.f32.vlgmr.msra.gmra.mxu1 %vm481_vm3, %v480_v29  ;;  %2599 = vmatprep.subr.mxu1 %v2921_v3 }
 0x113   :  { %2617 = vmatprep.mubr.msk.f32.mxu1 %vm2923_vm4, %v2921_v3 }
 0x1c0   :  { %v262_v31 = vpop.f32.mrf.mxu1 }
 0x1c1   :  { %v263_v32 = vadd.f32 %v262_v31, %v163_v30  ;;  %v3346_v30 = vld [vmem:[%s4050_s3 + $0xd0] sm:$0x1]  ;;  %v3351_v31 = vld [vmem:[%s4050_s3 + $0xb8] sm:$0xff] }
 0x1c2   :  { %v264_v33 = vpop.f32.mrf.mxu1  ;;  %2600 = vmatpush3.msk.msra.mxu1 %vm55_vm0, %v3346_v30 }
 0x1c3   :  { %v2413_v35 = vmul.f32 -1.442695, %v263_v32  ;;  %2601 = vmatprep.subr.mxu1 %v2921_v3  ;;  %v3359_v32 = vld [vmem:[%s4050_s3 + $0xa0] sm:$0xff]  ;;  %v3366_v33 = vld [vmem:[%s4050_s3 + $0x88] sm:$0xff] }
 0x1c4   :  { %v267_v36 = vpop.f32.mrf.mxu1  ;;  %2602 = vmatpush3.msra.mxu1 %v3351_v31 }
 0x1c5   :  { %v268_v37 = vadd.f32 %v267_v36, %v164_v34  ;;  %2790 = vpow2.f32 %v2413_v35  ;;  %2603 = vmatprep.subr.mxu1 %v2921_v3  ;;  %v3373_v34 = vld [vmem:[%s4050_s3 + $0x70] sm:$0xff]  ;;  %v3380_v36 = vld [vmem:[%s4050_s3 + $0x58] sm:$0xff] }
 0x1c6   :  { %v269_v38 = vpop.f32.mrf.mxu1  ;;  %2604 = vmatpush3.msra.mxu1 %v3359_v32 }
 0x1c7   :  { %v2414_v39 = vmul.f32 -1.442695, %v268_v37  ;;  %2605 = vmatprep.subr.mxu1 %v2921_v3  ;;  %v3387_v38 = vld [vmem:[%s4050_s3 + $0x40] sm:$0xff] }
 0x1c8   :  { %2606 = vmatpush3.msra.mxu1 %v3366_v33 }
 0x1c9   :  { %2792 = vpow2.f32 %v2414_v39  ;;  %2607 = vmatprep.subr.mxu1 %v2921_v3  ;;  %v3395_v39 = vld [vmem:[%s4050_s3 + $0x28] sm:$0xff] }
 0x1ca   :  { %2608 = vmatpush3.msra.mxu1 %v3373_v34 }
 0x1cb   :  { %2609 = vmatprep.subr.mxu1 %v2921_v3 }
 0x1cc   :  { %2610 = vmatpush3.msra.mxu1 %v3380_v36 }
 0x1cd   :  { %2611 = vmatprep.subr.mxu1 %v2921_v3 }
 0x1ce   :  { %2612 = vmatpush3.msra.mxu1 %v3387_v38 }
 0x1cf   :  { %2613 = vmatprep.subr.mxu1 %v2921_v3 }
 0x1d0   :  { %2614 = vmatpush3.msra.mxu1 %v3395_v39 }
 0x1d1   :  { %2615 = vmatprep.subr.mxu1 %v2921_v3 }
 0x1d2   :  { %v3269_v40 = vpop.f32.mrf.mxu1  ;;  %v2791_v41 = vpop.eup %2790 }
 0x1d3   :  { %569 = vrot.lane.b32.xlu0 %v3269_v40, %s2924_s29  ;;  %v277_v44 = vadd.f32 1.0, %v2791_v41 }
 0x1d4   :  { %v559_v42 = vpop.f32.mrf.mxu1 }
 0x1d6   :  { %v2793_v43 = vpop.eup %2792 }
 0x1d7   :  { %v278_v45 = vadd.f32 1.0, %v2793_v43 }
 0x1d9   :  { %2794 = vrcp.f32 %v278_v45 }
 0x1da   :  { %2796 = vrcp.f32 %v277_v44 }
 0x1e6   :  { %v2795_v46 = vpop.eup %2794 }
 0x1e7   :  { %2572 = vmatpush3.msra.mxu0 %v2795_v46  ;;  %v2797_v49 = vpop.eup %2796 }
 0x1e8   :  { %2573 = vmatprep.subr.mxu0 %v2921_v3 }
 0x1e9   :  { %2574 = vmatpush3.msra.mxu0 %v2797_v49 }
 0x1ea   :  { %2576 = vmatmul.mubr.msk.f32.vlgmr.msra.gmra.mxu0 %vm284_vm5, %v283_v47  ;;  %2578 = vmatprep.subr.mxu0 %v366_v48 }
 0x1eb   :  { %2579 = vmatpush3.msra.mxu0 %v366_v48  ;;  %2596 = vmatprep.mubr.msk.f32.mxu0 %vm369_vm6, %v2797_v49 }
 0x1ec   :  { %2580 = vmatprep.subr.mxu0 %v365_v50 }
 0x1ed   :  { %2581 = vmatpush3.msra.mxu0 %v365_v50 }
 0x1ee   :  { %2582 = vmatprep.subr.mxu0 %v364_v51 }
 0x1ef   :  { %2583 = vmatpush3.msra.mxu0 %v364_v51 }
 0x1f0   :  { %2584 = vmatprep.subr.mxu0 %v363_v52 }
 0x1f1   :  { %2585 = vmatpush3.msra.mxu0 %v363_v52 }
 0x1f2   :  { %2586 = vmatprep.subr.mxu0 %v362_v54 }
 0x1f3   :  { %2587 = vmatpush3.msra.mxu0 %v362_v54 }
 0x1f4   :  { %2588 = vmatprep.subr.mxu0 %v361_v55 }
 0x1f5   :  { %2589 = vmatpush3.msra.mxu0 %v361_v55 }
 0x1f6   :  { %2590 = vmatprep.subr.mxu0 %v360_v56 }
 0x1f7   :  { %2591 = vmatpush3.msra.mxu0 %v360_v56 }
 0x1f8   :  { %2592 = vmatprep.subr.mxu0 %v359_v57 }
 0x1f9   :  { %2593 = vmatpush3.msra.mxu0 %v359_v57 }
 0x1fa   :  { %2594 = vmatprep.subr.mxu0 %v358_v58 }
 0x1fb   :  { %2595 = vmatpush3.msra.mxu0 %v358_v58 }
 0x1fc   :  { %2597 = vmatmul.mubr.msk.f32.vlgmr.msra.gmra.mxu0 %vm369_vm6, %v2795_v46  ;;  %2422 = vmatprep.subr.msk.mxu0 %vm55_vm0, %v3146_v53 }
 0x1fd   :  { %2423 = vmatpush1.msk.msra.mxu0 %vm55_vm0, %v3153_v8  ;;  %667 = vmatprep.mubr.f32.mxu0 %v2921_v3 }
 0x1fe   :  { %619 = vmatprep.subr.mxu0 %v3159_v10 }
 0x1ff   :  { %620 = vmatpush1.msra.mxu0 %v3164_v11 }
 0x200   :  { %621 = vmatprep.subr.mxu0 %v3171_v12 }
 0x201   :  { %622 = vmatpush1.msra.mxu0 %v3177_v14 }
 0x202   :  { %623 = vmatprep.subr.mxu0 %v3184_v16 }
 0x203   :  { %624 = vmatpush1.msra.mxu0 %v3190_v17 }
 0x204   :  { %625 = vmatprep.subr.mxu0 %v3196_v18 }
 0x205   :  { %626 = vmatpush1.msra.mxu0 %v3203_v19 }
 0x206   :  { %627 = vmatprep.subr.mxu0 %v3209_v20 }
 0x207   :  { %628 = vmatpush1.msra.mxu0 %v3215_v21 }
 0x208   :  { %629 = vmatprep.subr.mxu0 %v3221_v22 }
 0x209   :  { %630 = vmatpush1.msra.mxu0 %v3227_v23 }
 0x20a   :  { %631 = vmatprep.subr.mxu0 %v3233_v24 }
 0x20b   :  { %632 = vmatpush1.msra.mxu0 %v3239_v25 }
 0x20c   :  { %633 = vmatprep.subr.mxu0 %v3245_v26 }
 0x20d   :  { %634 = vmatpush1.msra.mxu0 %v3251_v27 }
 0x20e   :  { %2429 = vmatprep.subr.msk.mxu0 %vm55_vm0, %v3146_v53 }
 0x245   :  { %v570_v6 = vpop.permute.xlu0 %569 }
 0x2aa   :  { %v3329_v59 = vpop.f32.mrf.mxu0 }
 0x2ac   :  { %v2577_v60 = vpop.f32.mrf.mxu0 }
 0x2bc   :  { %v3331_v61 = vpop.f32.mrf.mxu0 }
 0x2be   :  { %v442_v63 = vpop.f32.mrf.mxu0 }
 0x2bf   :  { %v3336_v0 = vadd.f32 %v442_v63, %v367_v62 }
 0x2c1   :  { %v561_v1 = vadd.f32 %v3269_v40, %v3336_v0  ;;  %v3404_v40 = vld [vmem:[%s4050_s3 + $0x10] sm:$0xff] }
 0x2c2   :  { %2616 = vmatpush3.msra.mxu1 %v3404_v40 }
 0x2c3   :  { %v2421_v2 = vmul.f32 -1.442695, %v561_v1  ;;  %2620 = vmatprep.subr.mxu1 %v2921_v3 }
 0x2c5   :  { %2798 = vpow2.f32 %v2421_v2 }
 0x2d2   :  { %v2799_v4 = vpop.eup %2798 }
 0x2d3   :  { %v565_v5 = vadd.f32 1.0, %v2799_v4 }
 0x2d5   :  { %2800 = vrcp.f32 %v565_v5 }
 0x2e2   :  { %v2801_v7 = vpop.eup %2800 }
 0x2e3   :  { %v572_v9 = vmul.f32 %v2801_v7, %v570_v6 }
 0x2e5   :  { %574 = vrot.lane.b32.xlu0 %v572_v9, %s2924_s29 }
 0x357   :  { %v575_v13 = vpop.permute.xlu0 %574 }
 0x358   :  { %v577_v15 = vadd.f32 %v575_v13, %v3336_v0 }
 0x35a   :  { %2802 = vtanh.f32 %v577_v15 }
 0x367   :  { %v2803_v28 = vpop.eup %2802 }
 0x368   :  { %v579_v29 = vsub.f32 0.0, %v2803_v28 }
 0x36a   :  { %581 = vrot.lane.b32.xlu1 %v579_v29, %s2925_s24 }
 0x3dc   :  { %v582_v35 = vpop.permute.xlu1 %581 }
 0x3dd   :  { %v584_v37 = vmul.f32 %v2801_v7, %v582_v35 }
 0x3df   :  { %586 = vrot.lane.b32.xlu1 %v584_v37, %s2926_s14 }
 0x451   :  { %v587_v41 = vpop.permute.xlu1 %586 }
 0x452   :  { %v3408_v42 = vadd.f32 %v2803_v28, %v587_v41 }
 0x454   :  { %591 = vrot.lane.b32.xlu0 %v3408_v42, %s2924_s29 }
 0x4c6   :  { %v592_v43 = vpop.permute.xlu0 %591 }
 0x4c7   :  { %v595_v44 = vsel %vm594_vm7, %v592_v43, 0.0 }
 0x4c8   :  { %v596_v45 = vsel %vm189_vm2, %v595_v44, 1.0 }
 0x4c9   :  { %2424 = vmatmul.mubr.msk.f32.vlgmr.msra.gmra.mxu0 %vm481_vm3, %v596_v45  ;;  %2618 = vmatmul.mubr.msk.f32.vlgmr.msra.gmra.mxu1 %vm481_vm3, %v596_v45 }
 0x4ca   :  { %2430 = vmatpush1.msk.msra.mxu0 %vm55_vm0, %v3153_v8  ;;  %2621 = vmatpush3.msk.msra.mxu1 %vm55_vm0, %v3346_v30 }
 0x4cb   :  { %852 = vmatprep.subr.mxu0 %v3159_v10  ;;  %2622 = vmatprep.subr.mxu1 %v2921_v3 }
 0x4cc   :  { %853 = vmatpush1.msra.mxu0 %v3164_v11  ;;  %2623 = vmatpush3.msra.mxu1 %v3351_v31 }
 0x4cd   :  { %854 = vmatprep.subr.mxu0 %v3171_v12  ;;  %2624 = vmatprep.subr.mxu1 %v2921_v3 }
 0x4ce   :  { %855 = vmatpush1.msra.mxu0 %v3177_v14  ;;  %2625 = vmatpush3.msra.mxu1 %v3359_v32 }
 0x4cf   :  { %856 = vmatprep.subr.mxu0 %v3184_v16  ;;  %2626 = vmatprep.subr.mxu1 %v2921_v3 }
 0x4d0   :  { %857 = vmatpush1.msra.mxu0 %v3190_v17  ;;  %2627 = vmatpush3.msra.mxu1 %v3366_v33 }
 0x4d1   :  { %858 = vmatprep.subr.mxu0 %v3196_v18  ;;  %2628 = vmatprep.subr.mxu1 %v2921_v3 }
 0x4d2   :  { %859 = vmatpush1.msra.mxu0 %v3203_v19  ;;  %2629 = vmatpush3.msra.mxu1 %v3373_v34 }
 0x4d3   :  { %860 = vmatprep.subr.mxu0 %v3209_v20  ;;  %2630 = vmatprep.subr.mxu1 %v2921_v3 }
 0x4d4   :  { %861 = vmatpush1.msra.mxu0 %v3215_v21  ;;  %2631 = vmatpush3.msra.mxu1 %v3380_v36 }
 0x4d5   :  { %862 = vmatprep.subr.mxu0 %v3221_v22  ;;  %2632 = vmatprep.subr.mxu1 %v2921_v3 }
 0x4d6   :  { %863 = vmatpush1.msra.mxu0 %v3227_v23  ;;  %2633 = vmatpush3.msra.mxu1 %v3387_v38 }
 0x4d7   :  { %864 = vmatprep.subr.mxu0 %v3233_v24  ;;  %2634 = vmatprep.subr.mxu1 %v2921_v3 }
 0x4d8   :  { %865 = vmatpush1.msra.mxu0 %v3239_v25  ;;  %2635 = vmatpush3.msra.mxu1 %v3395_v39 }
 0x4d9   :  { %866 = vmatprep.subr.mxu0 %v3245_v26  ;;  %2636 = vmatprep.subr.mxu1 %v2921_v3 }
 0x4da   :  { %867 = vmatpush1.msra.mxu0 %v3251_v27  ;;  %900 = vmatprep.mubr.f32.mxu0 %v2921_v3 }
 0x4db   :  { %2637 = vmatpush3.msra.mxu1 %v3404_v40  ;;  %2638 = vmatprep.mubr.msk.f32.mxu1 %vm2923_vm4, %v2921_v3 }
 0x4dc   :  { %2436 = vmatprep.subr.msk.mxu0 %vm55_vm0, %v3146_v53  ;;  %2641 = vmatprep.subr.mxu1 %v2921_v3 }
 0x589   :  { %v669_v46 = vpop.f32.mrf.mxu0  ;;  %v740_v47 = vpop.f32.mrf.mxu1 }
 0x58a   :  { %v787_v48 = vrot.slane %v669_v46, 6  ;;  %752 = vrot.lane.b32.xlu0 %v740_v47, %s2924_s29 }
 0x58b   :  { %v2619_v49 = vpop.f32.mrf.mxu1  ;;  %v671_v50 = vpop.f32.mrf.mxu0 }
 0x58c   :  { %796 = vrot.lane.b32.xlu1 %v787_v48, %s2924_s29  ;;  %v744_v51 = vadd.f32 %v740_v47, %v671_v50  ;;  %v789_v52 = vadd.f32 %v787_v48, %v3336_v0 }
 0x58e   :  { %v2427_v54 = vmul.f32 -1.442695, %v744_v51  ;;  %v2428_v55 = vmul.f32 -1.442695, %v789_v52 }
 0x590   :  { %2804 = vpow2.f32 %v2427_v54 }
 0x591   :  { %2806 = vpow2.f32 %v2428_v55 }
 0x59d   :  { %v2805_v56 = vpop.eup %2804 }
 0x59e   :  { %v2807_v57 = vpop.eup %2806  ;;  %v748_v58 = vadd.f32 1.0, %v2805_v56 }
 0x59f   :  { %v793_v60 = vadd.f32 1.0, %v2807_v57 }
 0x5a0   :  { %2808 = vrcp.f32 %v748_v58 }
 0x5a1   :  { %2810 = vrcp.f32 %v793_v60 }
 0x5ad   :  { %v2809_v62 = vpop.eup %2808 }
 0x5ae   :  { %v2811_v2 = vpop.eup %2810 }
 0x5fc   :  { %v753_v63 = vpop.permute.xlu0 %752 }
 0x5fd   :  { %v755_v1 = vmul.f32 %v2809_v62, %v753_v63 }
 0x5fe   :  { %v797_v4 = vpop.permute.xlu1 %796 }
 0x5ff   :  { %v799_v5 = vmul.f32 %v2811_v2, %v797_v4  ;;  %757 = vrot.lane.b32.xlu0 %v755_v1, %s2924_s29 }
 0x601   :  { %801 = vrot.lane.b32.xlu1 %v799_v5, %s2924_s29 }
 0x671   :  { %v758_v6 = vpop.permute.xlu0 %757 }
 0x672   :  { %v760_v7 = vadd.f32 %v758_v6, %v671_v50 }
 0x673   :  { %v802_v9 = vpop.permute.xlu1 %801 }
 0x674   :  { %2812 = vtanh.f32 %v760_v7  ;;  %v804_v13 = vadd.f32 %v802_v9, %v3336_v0 }
 0x676   :  { %2814 = vtanh.f32 %v804_v13 }
 0x681   :  { %v2813_v15 = vpop.eup %2812 }
 0x682   :  { %v762_v28 = vsub.f32 0.0, %v2813_v15 }
 0x683   :  { %v2815_v29 = vpop.eup %2814 }
 0x684   :  { %764 = vrot.lane.b32.xlu1 %v762_v28, %s2925_s24  ;;  %v807_v35 = vrot.slane %v2815_v29, 2 }
 0x686   :  { %v809_v37 = vsub.f32 %v3408_v42, %v807_v35 }
 0x688   :  { %v811_v41 = vrot.slane %v809_v37, 6 }
 0x68a   :  { %812 = vrot.lane.b32.xlu0 %v811_v41, %s2925_s24 }
 0x6f6   :  { %v765_v43 = vpop.permute.xlu1 %764 }
 0x6f7   :  { %v767_v44 = vmul.f32 %v2809_v62, %v765_v43 }
 0x6f9   :  { %769 = vrot.lane.b32.xlu1 %v767_v44, %s2926_s14 }
 0x6fc   :  { %v813_v45 = vpop.permute.xlu0 %812 }
 0x6fd   :  { %v815_v46 = vmul.f32 %v2811_v2, %v813_v45 }
 0x6ff   :  { %817 = vrot.lane.b32.xlu0 %v815_v46, %s2926_s14 }
 0x76b   :  { %v770_v47 = vpop.permute.xlu1 %769 }
 0x76c   :  { %v3469_v48 = vadd.f32 %v2813_v15, %v770_v47 }
 0x76e   :  { %v826_v49 = vrot.slane %v3469_v48, 6 }
 0x770   :  { %827 = vrot.lane.b32.xlu0 %v826_v49, %s2925_s24 }
 0x771   :  { %v818_v50 = vpop.permute.xlu0 %817 }
 0x772   :  { %v3473_v42 = vadd.f32 %v2815_v29, %v818_v50 }
 0x774   :  { %822 = vrot.lane.b32.xlu1 %v3473_v42, %s2924_s29 }
 0x7e2   :  { %v828_v51 = vpop.permute.xlu0 %827 }
 0x7e6   :  { %v823_v52 = vpop.permute.xlu1 %822 }
 0x7e7   :  { %v830_v54 = vsel %vm594_vm7, %v823_v52, %v828_v51 }
 0x7e8   :  { %v831_v55 = vsel %vm189_vm2, %v830_v54, 1.0 }
 0x7e9   :  { %v833_v56 = vrot.slane %v831_v55, 2 }
 0x7eb   :  { %2431 = vmatmul.mubr.msk.f32.vlgmr.msra.gmra.mxu0 %vm481_vm3, %v833_v56  ;;  %2639 = vmatmul.mubr.msk.f32.vlgmr.msra.gmra.mxu1 %vm481_vm3, %v833_v56 }
 0x7ec   :  { %2437 = vmatpush1.msk.msra.mxu0 %vm55_vm0, %v3153_v8  ;;  %2642 = vmatpush3.msk.msra.mxu1 %vm55_vm0, %v3346_v30 }
 0x7ed   :  { %1080 = vmatprep.subr.mxu0 %v3159_v10  ;;  %2643 = vmatprep.subr.mxu1 %v2921_v3 }
 0x7ee   :  { %1081 = vmatpush1.msra.mxu0 %v3164_v11  ;;  %2644 = vmatpush3.msra.mxu1 %v3351_v31 }
 0x7ef   :  { %1082 = vmatprep.subr.mxu0 %v3171_v12  ;;  %2645 = vmatprep.subr.mxu1 %v2921_v3 }
 0x7f0   :  { %1083 = vmatpush1.msra.mxu0 %v3177_v14  ;;  %2646 = vmatpush3.msra.mxu1 %v3359_v32 }
 0x7f1   :  { %1084 = vmatprep.subr.mxu0 %v3184_v16  ;;  %2647 = vmatprep.subr.mxu1 %v2921_v3 }
 0x7f2   :  { %1085 = vmatpush1.msra.mxu0 %v3190_v17  ;;  %2648 = vmatpush3.msra.mxu1 %v3366_v33 }
 0x7f3   :  { %1086 = vmatprep.subr.mxu0 %v3196_v18  ;;  %2649 = vmatprep.subr.mxu1 %v2921_v3 }
 0x7f4   :  { %1087 = vmatpush1.msra.mxu0 %v3203_v19  ;;  %2650 = vmatpush3.msra.mxu1 %v3373_v34 }
 0x7f5   :  { %1088 = vmatprep.subr.mxu0 %v3209_v20  ;;  %2651 = vmatprep.subr.mxu1 %v2921_v3 }
 0x7f6   :  { %1089 = vmatpush1.msra.mxu0 %v3215_v21  ;;  %2652 = vmatpush3.msra.mxu1 %v3380_v36 }
 0x7f7   :  { %1090 = vmatprep.subr.mxu0 %v3221_v22  ;;  %2653 = vmatprep.subr.mxu1 %v2921_v3 }
 0x7f8   :  { %1091 = vmatpush1.msra.mxu0 %v3227_v23  ;;  %2654 = vmatpush3.msra.mxu1 %v3387_v38 }
 0x7f9   :  { %1092 = vmatprep.subr.mxu0 %v3233_v24  ;;  %2655 = vmatprep.subr.mxu1 %v2921_v3 }
 0x7fa   :  { %1093 = vmatpush1.msra.mxu0 %v3239_v25  ;;  %2656 = vmatpush3.msra.mxu1 %v3395_v39 }
 0x7fb   :  { %1094 = vmatprep.subr.mxu0 %v3245_v26  ;;  %2657 = vmatprep.subr.mxu1 %v2921_v3 }
 0x7fc   :  { %1095 = vmatpush1.msra.mxu0 %v3251_v27  ;;  %1128 = vmatprep.mubr.f32.mxu0 %v2921_v3 }
 0x7fd   :  { %2658 = vmatpush3.msra.mxu1 %v3404_v40  ;;  %2659 = vmatprep.mubr.msk.f32.mxu1 %vm2923_vm4, %v2921_v3 }
 0x7fe   :  { %2443 = vmatprep.subr.msk.mxu0 %vm55_vm0, %v3146_v53  ;;  %2662 = vmatprep.subr.mxu1 %v2921_v3 }
 0x8ab   :  { %v902_v57 = vpop.f32.mrf.mxu0  ;;  %v973_v58 = vpop.f32.mrf.mxu1 }
 0x8ac   :  { %v1015_v60 = vrot.slane %v902_v57, 4  ;;  %985 = vrot.lane.b32.xlu0 %v973_v58, %s2924_s29 }
 0x8ad   :  { %v2640_v62 = vpop.f32.mrf.mxu1  ;;  %v904_v63 = vpop.f32.mrf.mxu0 }
 0x8ae   :  { %1024 = vrot.lane.b32.xlu1 %v1015_v60, %s2924_s29  ;;  %v977_v1 = vadd.f32 %v973_v58, %v904_v63  ;;  %v1017_v2 = vadd.f32 %v1015_v60, %v3336_v0 }
 0x8b0   :  { %v2434_v4 = vmul.f32 -1.442695, %v977_v1  ;;  %v2435_v5 = vmul.f32 -1.442695, %v1017_v2 }
 0x8b2   :  { %2816 = vpow2.f32 %v2434_v4 }
 0x8b3   :  { %2818 = vpow2.f32 %v2435_v5 }
 0x8bf   :  { %v2817_v6 = vpop.eup %2816 }
 0x8c0   :  { %v2819_v7 = vpop.eup %2818  ;;  %v981_v9 = vadd.f32 1.0, %v2817_v6 }
 0x8c1   :  { %v1021_v13 = vadd.f32 1.0, %v2819_v7 }
 0x8c2   :  { %2820 = vrcp.f32 %v981_v9 }
 0x8c3   :  { %2822 = vrcp.f32 %v1021_v13 }
 0x8cf   :  { %v2821_v15 = vpop.eup %2820 }
 0x8d0   :  { %v2823_v35 = vpop.eup %2822 }
 0x91e   :  { %v986_v28 = vpop.permute.xlu0 %985 }
 0x91f   :  { %v988_v29 = vmul.f32 %v2821_v15, %v986_v28 }
 0x920   :  { %v1025_v37 = vpop.permute.xlu1 %1024 }
 0x921   :  { %v1027_v41 = vmul.f32 %v2823_v35, %v1025_v37  ;;  %990 = vrot.lane.b32.xlu0 %v988_v29, %s2924_s29 }
 0x923   :  { %1029 = vrot.lane.b32.xlu1 %v1027_v41, %s2924_s29 }
 0x993   :  { %v991_v43 = vpop.permute.xlu0 %990 }
 0x994   :  { %v993_v44 = vadd.f32 %v991_v43, %v904_v63 }
 0x995   :  { %v1030_v45 = vpop.permute.xlu1 %1029 }
 0x996   :  { %2824 = vtanh.f32 %v993_v44  ;;  %v1032_v46 = vadd.f32 %v1030_v45, %v3336_v0 }
 0x998   :  { %2826 = vtanh.f32 %v1032_v46 }
 0x9a3   :  { %v2825_v47 = vpop.eup %2824 }
 0x9a4   :  { %v995_v49 = vsub.f32 %v3469_v48, %v2825_v47 }
 0x9a5   :  { %v2827_v50 = vpop.eup %2826 }
 0x9a6   :  { %997 = vrot.lane.b32.xlu1 %v995_v49, %s2925_s24  ;;  %v1035_v51 = vrot.slane %v2827_v50, 2 }
 0x9a8   :  { %v1037_v52 = vsub.f32 %v3473_v42, %v1035_v51 }
 0x9aa   :  { %v1039_v54 = vrot.slane %v1037_v52, 6 }
 0x9ac   :  { %1040 = vrot.lane.b32.xlu0 %v1039_v54, %s2925_s24 }
 0xa18   :  { %v998_v55 = vpop.permute.xlu1 %997 }
 0xa19   :  { %v1000_v56 = vmul.f32 %v2821_v15, %v998_v55 }
 0xa1b   :  { %1002 = vrot.lane.b32.xlu1 %v1000_v56, %s2926_s14 }
 0xa1e   :  { %v1041_v57 = vpop.permute.xlu0 %1040 }
 0xa1f   :  { %v1043_v58 = vmul.f32 %v2823_v35, %v1041_v57 }
 0xa21   :  { %1045 = vrot.lane.b32.xlu0 %v1043_v58, %s2926_s14 }
 0xa8d   :  { %v1003_v60 = vpop.permute.xlu1 %1002 }
 0xa8e   :  { %v3535_v62 = vadd.f32 %v2825_v47, %v1003_v60 }
 0xa90   :  { %v1054_v63 = vrot.slane %v3535_v62, 4 }
 0xa92   :  { %1055 = vrot.lane.b32.xlu0 %v1054_v63, %s2925_s24 }
 0xa93   :  { %v1046_v1 = vpop.permute.xlu0 %1045 }
 0xa94   :  { %v3539_v42 = vadd.f32 %v2827_v50, %v1046_v1 }
 0xa96   :  { %1050 = vrot.lane.b32.xlu1 %v3539_v42, %s2924_s29 }
 0xb04   :  { %v1056_v2 = vpop.permute.xlu0 %1055 }
 0xb08   :  { %v1051_v4 = vpop.permute.xlu1 %1050 }
 0xb09   :  { %v1058_v5 = vsel %vm594_vm7, %v1051_v4, %v1056_v2 }
 0xb0a   :  { %v1059_v6 = vsel %vm189_vm2, %v1058_v5, 1.0 }
 0xb0b   :  { %v1061_v7 = vrot.slane %v1059_v6, 4 }
 0xb0d   :  { %2438 = vmatmul.mubr.msk.f32.vlgmr.msra.gmra.mxu0 %vm481_vm3, %v1061_v7  ;;  %2660 = vmatmul.mubr.msk.f32.vlgmr.msra.gmra.mxu1 %vm481_vm3, %v1061_v7 }
 0xb0e   :  { %2444 = vmatpush1.msk.msra.mxu0 %vm55_vm0, %v3153_v8  ;;  %2663 = vmatpush3.msk.msra.mxu1 %vm55_vm0, %v3346_v30 }
 0xb0f   :  { %1308 = vmatprep.subr.mxu0 %v3159_v10  ;;  %2664 = vmatprep.subr.mxu1 %v2921_v3 }
 0xb10   :  { %1309 = vmatpush1.msra.mxu0 %v3164_v11  ;;  %2665 = vmatpush3.msra.mxu1 %v3351_v31 }
 0xb11   :  { %1310 = vmatprep.subr.mxu0 %v3171_v12  ;;  %2666 = vmatprep.subr.mxu1 %v2921_v3 }
 0xb12   :  { %1311 = vmatpush1.msra.mxu0 %v3177_v14  ;;  %2667 = vmatpush3.msra.mxu1 %v3359_v32 }
 0xb13   :  { %1312 = vmatprep.subr.mxu0 %v3184_v16  ;;  %2668 = vmatprep.subr.mxu1 %v2921_v3 }
 0xb14   :  { %1313 = vmatpush1.msra.mxu0 %v3190_v17  ;;  %2669 = vmatpush3.msra.mxu1 %v3366_v33 }
 0xb15   :  { %1314 = vmatprep.subr.mxu0 %v3196_v18  ;;  %2670 = vmatprep.subr.mxu1 %v2921_v3 }
 0xb16   :  { %1315 = vmatpush1.msra.mxu0 %v3203_v19  ;;  %2671 = vmatpush3.msra.mxu1 %v3373_v34 }
 0xb17   :  { %1316 = vmatprep.subr.mxu0 %v3209_v20  ;;  %2672 = vmatprep.subr.mxu1 %v2921_v3 }
 0xb18   :  { %1317 = vmatpush1.msra.mxu0 %v3215_v21  ;;  %2673 = vmatpush3.msra.mxu1 %v3380_v36 }
 0xb19   :  { %1318 = vmatprep.subr.mxu0 %v3221_v22  ;;  %2674 = vmatprep.subr.mxu1 %v2921_v3 }
 0xb1a   :  { %1319 = vmatpush1.msra.mxu0 %v3227_v23  ;;  %2675 = vmatpush3.msra.mxu1 %v3387_v38 }
 0xb1b   :  { %1320 = vmatprep.subr.mxu0 %v3233_v24  ;;  %2676 = vmatprep.subr.mxu1 %v2921_v3 }
 0xb1c   :  { %1321 = vmatpush1.msra.mxu0 %v3239_v25  ;;  %2677 = vmatpush3.msra.mxu1 %v3395_v39 }
 0xb1d   :  { %1322 = vmatprep.subr.mxu0 %v3245_v26  ;;  %2678 = vmatprep.subr.mxu1 %v2921_v3 }
 0xb1e   :  { %1323 = vmatpush1.msra.mxu0 %v3251_v27  ;;  %1356 = vmatprep.mubr.f32.mxu0 %v2921_v3 }
 0xb1f   :  { %2679 = vmatpush3.msra.mxu1 %v3404_v40  ;;  %2680 = vmatprep.mubr.msk.f32.mxu1 %vm2923_vm4, %v2921_v3 }
 0xb20   :  { %2450 = vmatprep.subr.msk.mxu0 %vm55_vm0, %v3146_v53  ;;  %2683 = vmatprep.subr.mxu1 %v2921_v3 }
 0xbcd   :  { %v1130_v9 = vpop.f32.mrf.mxu0  ;;  %v1201_v13 = vpop.f32.mrf.mxu1 }
 0xbce   :  { %v1243_v15 = vrot.slane %v1130_v9, 2  ;;  %1213 = vrot.lane.b32.xlu0 %v1201_v13, %s2924_s29 }
 0xbcf   :  { %v2661_v28 = vpop.f32.mrf.mxu1  ;;  %v1132_v29 = vpop.f32.mrf.mxu0 }
 0xbd0   :  { %1252 = vrot.lane.b32.xlu1 %v1243_v15, %s2924_s29  ;;  %v1205_v35 = vadd.f32 %v1201_v13, %v1132_v29  ;;  %v1245_v37 = vadd.f32 %v1243_v15, %v3336_v0 }
 0xbd2   :  { %v2441_v41 = vmul.f32 -1.442695, %v1205_v35  ;;  %v2442_v43 = vmul.f32 -1.442695, %v1245_v37 }
 0xbd4   :  { %2828 = vpow2.f32 %v2441_v41 }
 0xbd5   :  { %2830 = vpow2.f32 %v2442_v43 }
 0xbe1   :  { %v2829_v44 = vpop.eup %2828 }
 0xbe2   :  { %v2831_v53 = vpop.eup %2830  ;;  %v1209_v45 = vadd.f32 1.0, %v2829_v44 }
 0xbe3   :  { %v1249_v46 = vadd.f32 1.0, %v2831_v53 }
 0xbe4   :  { %2832 = vrcp.f32 %v1209_v45 }
 0xbe5   :  { %2834 = vrcp.f32 %v1249_v46 }
 0xbf1   :  { %v2833_v47 = vpop.eup %2832 }
 0xbf2   :  { %v2835_v51 = vpop.eup %2834 }
 0xc40   :  { %v1214_v49 = vpop.permute.xlu0 %1213 }
 0xc41   :  { %v1216_v50 = vmul.f32 %v2833_v47, %v1214_v49 }
 0xc42   :  { %v1253_v52 = vpop.permute.xlu1 %1252 }
 0xc43   :  { %v1255_v54 = vmul.f32 %v2835_v51, %v1253_v52  ;;  %1218 = vrot.lane.b32.xlu0 %v1216_v50, %s2924_s29 }
 0xc45   :  { %1257 = vrot.lane.b32.xlu1 %v1255_v54, %s2924_s29 }
 0xcb5   :  { %v1219_v55 = vpop.permute.xlu0 %1218 }
 0xcb6   :  { %v1221_v56 = vadd.f32 %v1219_v55, %v1132_v29 }
 0xcb7   :  { %v1258_v57 = vpop.permute.xlu1 %1257 }
 0xcb8   :  { %2836 = vtanh.f32 %v1221_v56  ;;  %v1260_v58 = vadd.f32 %v1258_v57, %v3336_v0 }
 0xcba   :  { %2838 = vtanh.f32 %v1260_v58 }
 0xcc5   :  { %v2837_v60 = vpop.eup %2836 }
 0xcc6   :  { %v1223_v63 = vsub.f32 %v3535_v62, %v2837_v60 }
 0xcc7   :  { %v2839_v1 = vpop.eup %2838 }
 0xcc8   :  { %1225 = vrot.lane.b32.xlu1 %v1223_v63, %s2925_s24  ;;  %v1263_v2 = vrot.slane %v2839_v1, 2 }
 0xcca   :  { %v1265_v4 = vsub.f32 %v3539_v42, %v1263_v2 }
 0xccc   :  { %v1267_v5 = vrot.slane %v1265_v4, 6 }
 0xcce   :  { %1268 = vrot.lane.b32.xlu0 %v1267_v5, %s2925_s24 }
 0xd3a   :  { %v1226_v6 = vpop.permute.xlu1 %1225 }
 0xd3b   :  { %v1228_v7 = vmul.f32 %v2833_v47, %v1226_v6 }
 0xd3d   :  { %1230 = vrot.lane.b32.xlu1 %v1228_v7, %s2926_s14 }
 0xd40   :  { %v1269_v9 = vpop.permute.xlu0 %1268 }
 0xd41   :  { %v1271_v13 = vmul.f32 %v2835_v51, %v1269_v9 }
 0xd43   :  { %1273 = vrot.lane.b32.xlu0 %v1271_v13, %s2926_s14 }
 0xdaf   :  { %v1231_v0 = vpop.permute.xlu1 %1230 }
 0xdb0   :  { %v3601_v15 = vadd.f32 %v2837_v60, %v1231_v0 }
 0xdb2   :  { %v1282_v28 = vrot.slane %v3601_v15, 2 }
 0xdb4   :  { %1283 = vrot.lane.b32.xlu0 %v1282_v28, %s2925_s24 }
 0xdb5   :  { %v1274_v29 = vpop.permute.xlu0 %1273 }
 0xdb6   :  { %v3605_v42 = vadd.f32 %v2839_v1, %v1274_v29  ;;  %v3693_v29 = vld [vmem:[%s4050_s3 + $0xc0] sm:$0x1] }
 0xdb8   :  { %1278 = vrot.lane.b32.xlu1 %v3605_v42, %s2924_s29 }
 0xe26   :  { %v1284_v35 = vpop.permute.xlu0 %1283 }
 0xe2a   :  { %v1279_v37 = vpop.permute.xlu1 %1278 }
 0xe2b   :  { %v1286_v41 = vsel %vm594_vm7, %v1279_v37, %v1284_v35  ;;  %v3709_v35 = vld [vmem:[%s4050_s3 + $0xa8] sm:$0xff]  ;;  %v3723_v37 = vld [vmem:[%s4050_s3 + $0x90] sm:$0xff] }
 0xe2c   :  { %v1287_v43 = vsel %vm189_vm2, %v1286_v41, 1.0  ;;  %v3737_v41 = vld [vmem:[%s4050_s3 + $0x78] sm:$0xff] }
 0xe2d   :  { %v1289_v44 = vrot.slane %v1287_v43, 6  ;;  %v3751_v43 = vld [vmem:[%s4050_s3 + $0x60] sm:$0xff] }
 0xe2f   :  { %2445 = vmatmul.mubr.msk.f32.vlgmr.msra.gmra.mxu0 %vm481_vm3, %v1289_v44  ;;  %2681 = vmatmul.mubr.msk.f32.vlgmr.msra.gmra.mxu1 %vm481_vm3, %v1289_v44  ;;  %v3765_v44 = vld [vmem:[%s4050_s3 + $0x48] sm:$0xff] }
 0xe30   :  { %2451 = vmatpush1.msk.msra.mxu0 %vm55_vm0, %v3153_v8  ;;  %2684 = vmatpush3.msk.msra.mxu1 %vm55_vm0, %v3346_v30  ;;  %v3655_v8 = vld [vmem:[%s4050_s3 + $0xc8] sm:$0x1] }
 0xe31   :  { %1532 = vmatprep.subr.mxu0 %v3159_v10  ;;  %2685 = vmatprep.subr.mxu1 %v2921_v3 }
 0xe32   :  { %1533 = vmatpush1.msra.mxu0 %v3164_v11  ;;  %2686 = vmatpush3.msra.mxu1 %v3351_v31 }
 0xe33   :  { %1534 = vmatprep.subr.mxu0 %v3171_v12  ;;  %2687 = vmatprep.subr.mxu1 %v2921_v3 }
 0xe34   :  { %1535 = vmatpush1.msra.mxu0 %v3177_v14  ;;  %2688 = vmatpush3.msra.mxu1 %v3359_v32  ;;  %v368_v14 = vld [vmem:[%s4051_s4 + $0x8] sm:$0xff] }
 0xe35   :  { %1536 = vmatprep.subr.mxu0 %v3184_v16  ;;  %2689 = vmatprep.subr.mxu1 %v2921_v3  ;;  %v3666_v16 = vadd.f32 %v3331_v61, %v368_v14 }
 0xe36   :  { %1537 = vmatpush1.msra.mxu0 %v3190_v17  ;;  %2690 = vmatpush3.msra.mxu1 %v3366_v33 }
 0xe37   :  { %1538 = vmatprep.subr.mxu0 %v3196_v18  ;;  %2691 = vmatprep.subr.mxu1 %v2921_v3 }
 0xe38   :  { %1539 = vmatpush1.msra.mxu0 %v3203_v19  ;;  %2692 = vmatpush3.msra.mxu1 %v3373_v34 }
 0xe39   :  { %1540 = vmatprep.subr.mxu0 %v3209_v20  ;;  %2693 = vmatprep.subr.mxu1 %v2921_v3 }
 0xe3a   :  { %1541 = vmatpush1.msra.mxu0 %v3215_v21  ;;  %2694 = vmatpush3.msra.mxu1 %v3380_v36 }
 0xe3b   :  { %1542 = vmatprep.subr.mxu0 %v3221_v22  ;;  %2695 = vmatprep.subr.mxu1 %v2921_v3 }
 0xe3c   :  { %1543 = vmatpush1.msra.mxu0 %v3227_v23  ;;  %2696 = vmatpush3.msra.mxu1 %v3387_v38 }
 0xe3d   :  { %1544 = vmatprep.subr.mxu0 %v3233_v24  ;;  %2697 = vmatprep.subr.mxu1 %v2921_v3 }
 0xe3e   :  { %1545 = vmatpush1.msra.mxu0 %v3239_v25  ;;  %2698 = vmatpush3.msra.mxu1 %v3395_v39 }
 0xe3f   :  { %1546 = vmatprep.subr.mxu0 %v3245_v26  ;;  %2699 = vmatprep.subr.mxu1 %v2921_v3 }
 0xe40   :  { %1547 = vmatpush1.msra.mxu0 %v3251_v27  ;;  %1580 = vmatprep.mubr.f32.mxu0 %v2921_v3 }
 0xe41   :  { %2700 = vmatpush3.msra.mxu1 %v3404_v40  ;;  %2701 = vmatprep.mubr.msk.f32.mxu1 %vm2923_vm4, %v2921_v3 }
 0xe42   :  { %2457 = vmatprep.subr.msk.mxu0 %vm55_vm0, %v3655_v8  ;;  %2704 = vmatprep.subr.mxu1 %v2921_v3 }
 0xeef   :  { %v1358_v10 = vpop.f32.mrf.mxu0  ;;  %v1429_v11 = vpop.f32.mrf.mxu1 }
 0xef0   :  { %1441 = vrot.lane.b32.xlu0 %v1429_v11, %s2924_s29  ;;  %1478 = vrot.lane.b32.xlu1 %v1358_v10, %s2924_s29  ;;  %v1470_v18 = vadd.f32 %v1358_v10, %v3666_v16  ;;  %v3779_v10 = vld [vmem:[%s4050_s3 + $0x30] sm:$0xff] }
 0xef1   :  { %v2682_v12 = vpop.f32.mrf.mxu1  ;;  %v1360_v17 = vpop.f32.mrf.mxu0 }
 0xef2   :  { %v1433_v19 = vadd.f32 %v1429_v11, %v1360_v17  ;;  %v2449_v20 = vmul.f32 -1.442695, %v1470_v18  ;;  %v3793_v11 = vld [vmem:[%s4050_s3 + $0x18] sm:$0xff]  ;;  %v3807_v12 = vld [vmem:[%s4050_s3] sm:$0xff] }
 0xef4   :  { %v2448_v21 = vmul.f32 -1.442695, %v1433_v19  ;;  %2840 = vpow2.f32 %v2449_v20 }
 0xef6   :  { %2842 = vpow2.f32 %v2448_v21 }
 0xf01   :  { %v2841_v22 = vpop.eup %2840 }
 0xf02   :  { %v1474_v24 = vadd.f32 1.0, %v2841_v22 }
 0xf03   :  { %v2843_v23 = vpop.eup %2842 }
 0xf04   :  { %v1437_v25 = vadd.f32 1.0, %v2843_v23  ;;  %2844 = vrcp.f32 %v1474_v24 }
 0xf06   :  { %2846 = vrcp.f32 %v1437_v25 }
 0xf11   :  { %v2845_v26 = vpop.eup %2844 }
 0xf13   :  { %v2847_v27 = vpop.eup %2846 }
 0xf62   :  { %v1442_v53 = vpop.permute.xlu0 %1441  ;;  %v1479_v45 = vpop.permute.xlu1 %1478 }
 0xf63   :  { %v1444_v61 = vmul.f32 %v2847_v27, %v1442_v53  ;;  %v1481_v46 = vmul.f32 %v2845_v26, %v1479_v45 }
 0xf65   :  { %1483 = vrot.lane.b32.xlu1 %v1481_v46, %s2924_s29  ;;  %1446 = vrot.lane.b32.xlu0 %v1444_v61, %s2924_s29 }
 0xfd7   :  { %v1484_v47 = vpop.permute.xlu1 %1483  ;;  %v1447_v49 = vpop.permute.xlu0 %1446 }
 0xfd8   :  { %v1486_v50 = vadd.f32 %v1484_v47, %v3666_v16  ;;  %v1449_v51 = vadd.f32 %v1447_v49, %v1360_v17 }
 0xfda   :  { %2848 = vtanh.f32 %v1486_v50 }
 0xfdb   :  { %2850 = vtanh.f32 %v1449_v51 }
 0xfe7   :  { %v2849_v52 = vpop.eup %2848 }
 0xfe8   :  { %v2851_v54 = vpop.eup %2850  ;;  %v1489_v55 = vrot.slane %v2849_v52, 2 }
 0xfe9   :  { %v1451_v56 = vsub.f32 %v3601_v15, %v2851_v54 }
 0xfea   :  { %v1491_v57 = vsub.f32 %v3605_v42, %v1489_v55  ;;  %v3702_v42 = vld [vmem:[%s4050_s3 + $0xb0] sm:$0xff] }
 0xfeb   :  { %1453 = vrot.lane.b32.xlu1 %v1451_v56, %s2925_s24 }
 0xfec   :  { %v1493_v58 = vrot.slane %v1491_v57, 6 }
 0xfee   :  { %1494 = vrot.lane.b32.xlu0 %v1493_v58, %s2925_s24 }
0x105d   :  { %v1454_v60 = vpop.permute.xlu1 %1453 }
0x105e   :  { %v1456_v63 = vmul.f32 %v2847_v27, %v1454_v60 }
0x1060   :  { %1458 = vrot.lane.b32.xlu1 %v1456_v63, %s2926_s14  ;;  %v1495_v1 = vpop.permute.xlu0 %1494 }
0x1061   :  { %v1497_v2 = vmul.f32 %v2845_v26, %v1495_v1 }
0x1063   :  { %1499 = vrot.lane.b32.xlu0 %v1497_v2, %s2926_s14 }
0x10d2   :  { %v1459_v4 = vpop.permute.xlu1 %1458 }
0x10d3   :  { %v3678_v5 = vadd.f32 %v2851_v54, %v1459_v4 }
0x10d5   :  { %1508 = vrot.lane.b32.xlu0 %v3678_v5, %s2925_s24  ;;  %v1500_v6 = vpop.permute.xlu0 %1499 }
0x10d6   :  { %v3682_v7 = vadd.f32 %v2849_v52, %v1500_v6 }
0x10d8   :  { %1504 = vrot.lane.b32.xlu1 %v3682_v7, %s2924_s29 }
0x1147   :  { %v1509_v9 = vpop.permute.xlu0 %1508 }
0x114a   :  { %v1505_v13 = vpop.permute.xlu1 %1504 }
0x114b   :  { %v1511_v0 = vsel %vm594_vm7, %v1505_v13, %v1509_v9 }
0x114c   :  { %v1512_v28 = vsel %vm189_vm2, %v1511_v0, 1.0 }
0x114d   :  { %2452 = vmatmul.mubr.msk.f32.vlgmr.msra.gmra.mxu0 %vm481_vm3, %v1512_v28  ;;  %2702 = vmatmul.mubr.msk.f32.vlgmr.msra.gmra.mxu1 %vm481_vm3, %v1512_v28 }
0x114e   :  { %2458 = vmatpush1.msk.msra.mxu0 %vm55_vm0, %v3693_v29  ;;  %2705 = vmatpush3.msk.msra.mxu1 %vm55_vm0, %v3346_v30  ;;  %v3716_v30 = vld [vmem:[%s4050_s3 + $0x98] sm:$0xff] }
0x114f   :  { %1760 = vmatprep.subr.mxu0 %v3702_v42  ;;  %2706 = vmatprep.subr.mxu1 %v2921_v3 }
0x1150   :  { %1761 = vmatpush1.msra.mxu0 %v3709_v35  ;;  %2707 = vmatpush3.msra.mxu1 %v3351_v31  ;;  %v3730_v31 = vld [vmem:[%s4050_s3 + $0x80] sm:$0xff] }
0x1151   :  { %1762 = vmatprep.subr.mxu0 %v3716_v30  ;;  %2708 = vmatprep.subr.mxu1 %v2921_v3 }
0x1152   :  { %1763 = vmatpush1.msra.mxu0 %v3723_v37  ;;  %2709 = vmatpush3.msra.mxu1 %v3359_v32  ;;  %v3744_v32 = vld [vmem:[%s4050_s3 + $0x68] sm:$0xff] }
0x1153   :  { %1764 = vmatprep.subr.mxu0 %v3730_v31  ;;  %2710 = vmatprep.subr.mxu1 %v2921_v3 }
0x1154   :  { %1765 = vmatpush1.msra.mxu0 %v3737_v41  ;;  %2711 = vmatpush3.msra.mxu1 %v3366_v33  ;;  %v3758_v33 = vld [vmem:[%s4050_s3 + $0x50] sm:$0xff] }
0x1155   :  { %1766 = vmatprep.subr.mxu0 %v3744_v32  ;;  %2712 = vmatprep.subr.mxu1 %v2921_v3 }
0x1156   :  { %1767 = vmatpush1.msra.mxu0 %v3751_v43  ;;  %2713 = vmatpush3.msra.mxu1 %v3373_v34  ;;  %v3772_v34 = vld [vmem:[%s4050_s3 + $0x38] sm:$0xff] }
0x1157   :  { %1768 = vmatprep.subr.mxu0 %v3758_v33  ;;  %2714 = vmatprep.subr.mxu1 %v2921_v3 }
0x1158   :  { %1769 = vmatpush1.msra.mxu0 %v3765_v44  ;;  %2715 = vmatpush3.msra.mxu1 %v3380_v36  ;;  %v3786_v36 = vld [vmem:[%s4050_s3 + $0x20] sm:$0xff] }
0x1159   :  { %1770 = vmatprep.subr.mxu0 %v3772_v34  ;;  %2716 = vmatprep.subr.mxu1 %v2921_v3 }
0x115a   :  { %1771 = vmatpush1.msra.mxu0 %v3779_v10  ;;  %2717 = vmatpush3.msra.mxu1 %v3387_v38  ;;  %v3800_v38 = vld [vmem:[%s4050_s3 + $0x8] sm:$0xff] }
0x115b   :  { %1772 = vmatprep.subr.mxu0 %v3786_v36  ;;  %2718 = vmatprep.subr.mxu1 %v2921_v3 }
0x115c   :  { %1773 = vmatpush1.msra.mxu0 %v3793_v11  ;;  %2719 = vmatpush3.msra.mxu1 %v3395_v39 }
0x115d   :  { %1774 = vmatprep.subr.mxu0 %v3800_v38  ;;  %2720 = vmatprep.subr.mxu1 %v2921_v3 }
0x115e   :  { %1775 = vmatpush1.msra.mxu0 %v3807_v12  ;;  %1808 = vmatprep.mubr.f32.mxu0 %v2921_v3 }
0x115f   :  { %2721 = vmatpush3.msra.mxu1 %v3404_v40  ;;  %2722 = vmatprep.mubr.msk.f32.mxu1 %vm2923_vm4, %v2921_v3 }
0x1160   :  { %2464 = vmatprep.subr.msk.mxu0 %vm55_vm0, %v3655_v8  ;;  %2725 = vmatprep.subr.mxu1 %v2921_v3 }
0x120d   :  { %v1582_v39 = vpop.f32.mrf.mxu0  ;;  %v1653_v14 = vpop.f32.mrf.mxu1 }
0x120e   :  { %v1695_v17 = vrot.slane %v1582_v39, 6  ;;  %1665 = vrot.lane.b32.xlu0 %v1653_v14, %s2924_s29 }
0x120f   :  { %v2703_v18 = vpop.f32.mrf.mxu1  ;;  %v1584_v19 = vpop.f32.mrf.mxu0 }
0x1210   :  { %1704 = vrot.lane.b32.xlu1 %v1695_v17, %s2924_s29  ;;  %v1657_v20 = vadd.f32 %v1653_v14, %v1584_v19  ;;  %v1697_v40 = vadd.f32 %v1695_v17, %v3666_v16 }
0x1212   :  { %v2455_v21 = vmul.f32 -1.442695, %v1657_v20  ;;  %v2456_v22 = vmul.f32 -1.442695, %v1697_v40  ;;  %v3856_v20 = vld [vmem:[%s4050_s3 + $0xb8] sm:$0xff]  ;;  %v3865_v40 = vld [vmem:[%s4050_s3 + $0xa0] sm:$0xff] }
0x1214   :  { %2852 = vpow2.f32 %v2455_v21  ;;  %v3874_v21 = vld [vmem:[%s4050_s3 + $0x88] sm:$0xff] }
0x1215   :  { %2854 = vpow2.f32 %v2456_v22  ;;  %v3883_v22 = vld [vmem:[%s4050_s3 + $0x70] sm:$0xff] }
0x1221   :  { %v2853_v23 = vpop.eup %2852 }
0x1222   :  { %v2855_v24 = vpop.eup %2854  ;;  %v1661_v25 = vadd.f32 1.0, %v2853_v23  ;;  %v3892_v23 = vld [vmem:[%s4050_s3 + $0x58] sm:$0xff] }
0x1223   :  { %v1701_v26 = vadd.f32 1.0, %v2855_v24  ;;  %v3901_v24 = vld [vmem:[%s4050_s3 + $0x40] sm:$0xff] }
0x1224   :  { %2856 = vrcp.f32 %v1661_v25  ;;  %v3910_v25 = vld [vmem:[%s4050_s3 + $0x28] sm:$0xff] }
0x1225   :  { %2858 = vrcp.f32 %v1701_v26  ;;  %v3920_v26 = vld [vmem:[%s4050_s3 + $0x10] sm:$0xff] }
0x1231   :  { %v2857_v27 = vpop.eup %2856 }
0x1232   :  { %v2859_v61 = vpop.eup %2858 }
0x1280   :  { %v1666_v53 = vpop.permute.xlu0 %1665 }
0x1281   :  { %v1668_v45 = vmul.f32 %v2857_v27, %v1666_v53 }
0x1282   :  { %v1705_v46 = vpop.permute.xlu1 %1704 }
0x1283   :  { %v1707_v47 = vmul.f32 %v2859_v61, %v1705_v46  ;;  %1670 = vrot.lane.b32.xlu0 %v1668_v45, %s2924_s29 }
0x1285   :  { %1709 = vrot.lane.b32.xlu1 %v1707_v47, %s2924_s29 }
0x12f5   :  { %v1671_v49 = vpop.permute.xlu0 %1670 }
0x12f6   :  { %v1673_v50 = vadd.f32 %v1671_v49, %v1584_v19  ;;  %v3846_v19 = vld [vmem:[%s4050_s3 + $0xd0] sm:$0x1] }
0x12f7   :  { %v1710_v51 = vpop.permute.xlu1 %1709 }
0x12f8   :  { %2860 = vtanh.f32 %v1673_v50  ;;  %v1712_v52 = vadd.f32 %v1710_v51, %v3666_v16 }
0x12fa   :  { %2862 = vtanh.f32 %v1712_v52 }
0x1305   :  { %v2861_v54 = vpop.eup %2860 }
0x1306   :  { %v1675_v55 = vsub.f32 %v3678_v5, %v2861_v54 }
0x1307   :  { %v2863_v56 = vpop.eup %2862 }
0x1308   :  { %1677 = vrot.lane.b32.xlu1 %v1675_v55, %s2925_s24  ;;  %v1715_v57 = vrot.slane %v2863_v56, 2 }
0x130a   :  { %v1717_v58 = vsub.f32 %v3682_v7, %v1715_v57 }
0x130c   :  { %v1719_v60 = vrot.slane %v1717_v58, 6 }
0x130e   :  { %1720 = vrot.lane.b32.xlu0 %v1719_v60, %s2925_s24 }
0x137a   :  { %v1678_v63 = vpop.permute.xlu1 %1677 }
0x137b   :  { %v1680_v1 = vmul.f32 %v2857_v27, %v1678_v63 }
0x137d   :  { %1682 = vrot.lane.b32.xlu1 %v1680_v1, %s2926_s14 }
0x1380   :  { %v1721_v2 = vpop.permute.xlu0 %1720 }
0x1381   :  { %v1723_v4 = vmul.f32 %v2859_v61, %v1721_v2 }
0x1383   :  { %1725 = vrot.lane.b32.xlu0 %v1723_v4, %s2926_s14 }
0x13ef   :  { %v1683_v6 = vpop.permute.xlu1 %1682 }
0x13f0   :  { %v3829_v9 = vadd.f32 %v2861_v54, %v1683_v6 }
0x13f2   :  { %v1734_v13 = vrot.slane %v3829_v9, 6 }
0x13f4   :  { %1735 = vrot.lane.b32.xlu0 %v1734_v13, %s2925_s24 }
0x13f5   :  { %v1726_v0 = vpop.permute.xlu0 %1725 }
0x13f6   :  { %v3833_v7 = vadd.f32 %v2863_v56, %v1726_v0 }
0x13f8   :  { %1730 = vrot.lane.b32.xlu1 %v3833_v7, %s2924_s29 }
0x1466   :  { %v1736_v28 = vpop.permute.xlu0 %1735 }
0x146a   :  { %v1731_v39 = vpop.permute.xlu1 %1730 }
0x146b   :  { %v1738_v14 = vsel %vm594_vm7, %v1731_v39, %v1736_v28 }
0x146c   :  { %v1739_v17 = vsel %vm189_vm2, %v1738_v14, 1.0 }
0x146d   :  { %v1741_v18 = vrot.slane %v1739_v17, 2 }
0x146f   :  { %2459 = vmatmul.mubr.msk.f32.vlgmr.msra.gmra.mxu0 %vm481_vm3, %v1741_v18  ;;  %2723 = vmatmul.mubr.msk.f32.vlgmr.msra.gmra.mxu1 %vm481_vm3, %v1741_v18 }
0x1470   :  { %2465 = vmatpush1.msk.msra.mxu0 %vm55_vm0, %v3693_v29  ;;  %2726 = vmatpush3.msk.msra.mxu1 %vm55_vm0, %v3846_v19 }
0x1471   :  { %1988 = vmatprep.subr.mxu0 %v3702_v42  ;;  %2727 = vmatprep.subr.mxu1 %v2921_v3 }
0x1472   :  { %1989 = vmatpush1.msra.mxu0 %v3709_v35  ;;  %2728 = vmatpush3.msra.mxu1 %v3856_v20 }
0x1473   :  { %1990 = vmatprep.subr.mxu0 %v3716_v30  ;;  %2729 = vmatprep.subr.mxu1 %v2921_v3 }
0x1474   :  { %1991 = vmatpush1.msra.mxu0 %v3723_v37  ;;  %2730 = vmatpush3.msra.mxu1 %v3865_v40 }
0x1475   :  { %1992 = vmatprep.subr.mxu0 %v3730_v31  ;;  %2731 = vmatprep.subr.mxu1 %v2921_v3 }
0x1476   :  { %1993 = vmatpush1.msra.mxu0 %v3737_v41  ;;  %2732 = vmatpush3.msra.mxu1 %v3874_v21 }
0x1477   :  { %1994 = vmatprep.subr.mxu0 %v3744_v32  ;;  %2733 = vmatprep.subr.mxu1 %v2921_v3 }
0x1478   :  { %1995 = vmatpush1.msra.mxu0 %v3751_v43  ;;  %2734 = vmatpush3.msra.mxu1 %v3883_v22 }
0x1479   :  { %1996 = vmatprep.subr.mxu0 %v3758_v33  ;;  %2735 = vmatprep.subr.mxu1 %v2921_v3 }
0x147a   :  { %1997 = vmatpush1.msra.mxu0 %v3765_v44  ;;  %2736 = vmatpush3.msra.mxu1 %v3892_v23 }
0x147b   :  { %1998 = vmatprep.subr.mxu0 %v3772_v34  ;;  %2737 = vmatprep.subr.mxu1 %v2921_v3 }
0x147c   :  { %1999 = vmatpush1.msra.mxu0 %v3779_v10  ;;  %2738 = vmatpush3.msra.mxu1 %v3901_v24 }
0x147d   :  { %2000 = vmatprep.subr.mxu0 %v3786_v36  ;;  %2739 = vmatprep.subr.mxu1 %v2921_v3 }
0x147e   :  { %2001 = vmatpush1.msra.mxu0 %v3793_v11  ;;  %2740 = vmatpush3.msra.mxu1 %v3910_v25 }
0x147f   :  { %2002 = vmatprep.subr.mxu0 %v3800_v38  ;;  %2741 = vmatprep.subr.mxu1 %v2921_v3 }
0x1480   :  { %2003 = vmatpush1.msra.mxu0 %v3807_v12  ;;  %2036 = vmatprep.mubr.f32.mxu0 %v2921_v3 }
0x1481   :  { %2742 = vmatpush3.msra.mxu1 %v3920_v26  ;;  %2743 = vmatprep.mubr.msk.f32.mxu1 %vm2923_vm4, %v2921_v3 }
0x1482   :  { %2471 = vmatprep.subr.msk.mxu0 %vm55_vm0, %v3655_v8  ;;  %2746 = vmatprep.subr.mxu1 %v2921_v3 }
0x152f   :  { %v1810_v27 = vpop.f32.mrf.mxu0  ;;  %v1881_v53 = vpop.f32.mrf.mxu1 }
0x1530   :  { %v1923_v45 = vrot.slane %v1810_v27, 4  ;;  %1893 = vrot.lane.b32.xlu0 %v1881_v53, %s2924_s29 }
0x1531   :  { %v2724_v61 = vpop.f32.mrf.mxu1  ;;  %v1812_v46 = vpop.f32.mrf.mxu0 }
0x1532   :  { %1932 = vrot.lane.b32.xlu1 %v1923_v45, %s2924_s29  ;;  %v1885_v47 = vadd.f32 %v1881_v53, %v1812_v46  ;;  %v1925_v49 = vadd.f32 %v1923_v45, %v3666_v16 }
0x1534   :  { %v2462_v50 = vmul.f32 -1.442695, %v1885_v47  ;;  %v2463_v51 = vmul.f32 -1.442695, %v1925_v49 }
0x1536   :  { %2864 = vpow2.f32 %v2462_v50 }
0x1537   :  { %2866 = vpow2.f32 %v2463_v51 }
0x1543   :  { %v2865_v52 = vpop.eup %2864 }
0x1544   :  { %v2867_v8 = vpop.eup %2866  ;;  %v1889_v54 = vadd.f32 1.0, %v2865_v52 }
0x1545   :  { %v1929_v55 = vadd.f32 1.0, %v2867_v8 }
0x1546   :  { %2868 = vrcp.f32 %v1889_v54 }
0x1547   :  { %2870 = vrcp.f32 %v1929_v55 }
0x1553   :  { %v2869_v56 = vpop.eup %2868 }
0x1554   :  { %v2871_v60 = vpop.eup %2870 }
0x15a2   :  { %v1894_v57 = vpop.permute.xlu0 %1893 }
0x15a3   :  { %v1896_v58 = vmul.f32 %v2869_v56, %v1894_v57 }
0x15a4   :  { %v1933_v63 = vpop.permute.xlu1 %1932 }
0x15a5   :  { %v1935_v1 = vmul.f32 %v2871_v60, %v1933_v63  ;;  %1898 = vrot.lane.b32.xlu0 %v1896_v58, %s2924_s29 }
0x15a7   :  { %1937 = vrot.lane.b32.xlu1 %v1935_v1, %s2924_s29 }
0x1617   :  { %v1899_v2 = vpop.permute.xlu0 %1898 }
0x1618   :  { %v1901_v4 = vadd.f32 %v1899_v2, %v1812_v46 }
0x1619   :  { %v1938_v6 = vpop.permute.xlu1 %1937 }
0x161a   :  { %2872 = vtanh.f32 %v1901_v4  ;;  %v1940_v13 = vadd.f32 %v1938_v6, %v3666_v16 }
0x161c   :  { %2874 = vtanh.f32 %v1940_v13 }
0x1627   :  { %v2873_v0 = vpop.eup %2872 }
0x1628   :  { %v1903_v28 = vsub.f32 %v3829_v9, %v2873_v0 }
0x1629   :  { %v2875_v39 = vpop.eup %2874 }
0x162a   :  { %1905 = vrot.lane.b32.xlu1 %v1903_v28, %s2925_s24  ;;  %v1943_v14 = vrot.slane %v2875_v39, 2 }
0x162c   :  { %v1945_v17 = vsub.f32 %v3833_v7, %v1943_v14 }
0x162e   :  { %v1947_v18 = vrot.slane %v1945_v17, 6 }
0x1630   :  { %1948 = vrot.lane.b32.xlu0 %v1947_v18, %s2925_s24 }
0x169c   :  { %v1906_v27 = vpop.permute.xlu1 %1905 }
0x169d   :  { %v1908_v53 = vmul.f32 %v2869_v56, %v1906_v27 }
0x169f   :  { %1910 = vrot.lane.b32.xlu1 %v1908_v53, %s2926_s14 }
0x16a2   :  { %v1949_v45 = vpop.permute.xlu0 %1948 }
0x16a3   :  { %v1951_v61 = vmul.f32 %v2871_v60, %v1949_v45 }
0x16a5   :  { %1953 = vrot.lane.b32.xlu0 %v1951_v61, %s2926_s14 }
0x1711   :  { %v1911_v46 = vpop.permute.xlu1 %1910 }
0x1712   :  { %v3940_v47 = vadd.f32 %v2873_v0, %v1911_v46 }
0x1714   :  { %v1962_v49 = vrot.slane %v3940_v47, 4 }
0x1716   :  { %1963 = vrot.lane.b32.xlu0 %v1962_v49, %s2925_s24 }
0x1717   :  { %v1954_v50 = vpop.permute.xlu0 %1953 }
0x1718   :  { %v3944_v7 = vadd.f32 %v2875_v39, %v1954_v50 }
0x171a   :  { %1958 = vrot.lane.b32.xlu1 %v3944_v7, %s2924_s29 }
0x1788   :  { %v1964_v51 = vpop.permute.xlu0 %1963 }
0x178c   :  { %v1959_v52 = vpop.permute.xlu1 %1958 }
0x178d   :  { %v1966_v8 = vsel %vm594_vm7, %v1959_v52, %v1964_v51 }
0x178e   :  { %v1967_v54 = vsel %vm189_vm2, %v1966_v8, 1.0  ;;  %v478_v8 = vld [vmem:[%s4051_s4 + $0x28] sm:$0x3] }
0x178f   :  { %v1969_v55 = vrot.slane %v1967_v54, 4 }
0x1791   :  { %2466 = vmatmul.mubr.msk.f32.vlgmr.msra.gmra.mxu0 %vm481_vm3, %v1969_v55  ;;  %2744 = vmatmul.mubr.msk.f32.vlgmr.msra.gmra.mxu1 %vm481_vm3, %v1969_v55 }
0x1792   :  { %2472 = vmatpush1.msk.msra.mxu0 %vm55_vm0, %v3693_v29  ;;  %2747 = vmatpush3.msk.msra.mxu1 %vm55_vm0, %v3846_v19  ;;  %vm2397_vm0 = vcmask 648192  }
0x1793   :  { %2216 = vmatprep.subr.mxu0 %v3702_v42  ;;  %2748 = vmatprep.subr.mxu1 %v2921_v3 }
0x1794   :  { %2217 = vmatpush1.msra.mxu0 %v3709_v35  ;;  %2749 = vmatpush3.msra.mxu1 %v3856_v20 }
0x1795   :  { %2218 = vmatprep.subr.mxu0 %v3716_v30  ;;  %2750 = vmatprep.subr.mxu1 %v2921_v3 }
0x1796   :  { %2219 = vmatpush1.msra.mxu0 %v3723_v37  ;;  %2751 = vmatpush3.msra.mxu1 %v3865_v40 }
0x1797   :  { %2220 = vmatprep.subr.mxu0 %v3730_v31  ;;  %2752 = vmatprep.subr.mxu1 %v2921_v3 }
0x1798   :  { %2221 = vmatpush1.msra.mxu0 %v3737_v41  ;;  %2753 = vmatpush3.msra.mxu1 %v3874_v21 }
0x1799   :  { %2222 = vmatprep.subr.mxu0 %v3744_v32  ;;  %2754 = vmatprep.subr.mxu1 %v2921_v3 }
0x179a   :  { %2223 = vmatpush1.msra.mxu0 %v3751_v43  ;;  %2755 = vmatpush3.msra.mxu1 %v3883_v22 }
0x179b   :  { %2224 = vmatprep.subr.mxu0 %v3758_v33  ;;  %2756 = vmatprep.subr.mxu1 %v2921_v3 }
0x179c   :  { %2225 = vmatpush1.msra.mxu0 %v3765_v44  ;;  %2757 = vmatpush3.msra.mxu1 %v3892_v23 }
0x179d   :  { %2226 = vmatprep.subr.mxu0 %v3772_v34  ;;  %2758 = vmatprep.subr.mxu1 %v2921_v3 }
0x179e   :  { %2227 = vmatpush1.msra.mxu0 %v3779_v10  ;;  %2759 = vmatpush3.msra.mxu1 %v3901_v24 }
0x179f   :  { %2228 = vmatprep.subr.mxu0 %v3786_v36  ;;  %2760 = vmatprep.subr.mxu1 %v2921_v3 }
0x17a0   :  { %2229 = vmatpush1.msra.mxu0 %v3793_v11  ;;  %2761 = vmatpush3.msra.mxu1 %v3910_v25 }
0x17a1   :  { %2230 = vmatprep.subr.mxu0 %v3800_v38  ;;  %2762 = vmatprep.subr.mxu1 %v2921_v3 }
0x17a2   :  { %2231 = vmatpush1.msra.mxu0 %v3807_v12  ;;  %2264 = vmatprep.mubr.f32.mxu0 %v2921_v3 }
0x17a3   :  { %2763 = vmatpush3.msra.mxu1 %v3920_v26  ;;  %2764 = vmatprep.mubr.msk.f32.mxu1 %vm2923_vm4, %v2921_v3 }
0x1851   :  { %v2038_v29 = vpop.f32.mrf.mxu0  ;;  %v2109_v42 = vpop.f32.mrf.mxu1 }
0x1852   :  { %v2151_v35 = vrot.slane %v2038_v29, 2  ;;  %2121 = vrot.lane.b32.xlu0 %v2109_v42, %s2924_s29 }
0x1853   :  { %v2745_v30 = vpop.f32.mrf.mxu1  ;;  %v2040_v37 = vpop.f32.mrf.mxu0 }
0x1854   :  { %2160 = vrot.lane.b32.xlu1 %v2151_v35, %s2924_s29  ;;  %v2113_v31 = vadd.f32 %v2109_v42, %v2040_v37  ;;  %v2153_v41 = vadd.f32 %v2151_v35, %v3666_v16 }
0x1856   :  { %v2469_v32 = vmul.f32 -1.442695, %v2113_v31  ;;  %v2470_v43 = vmul.f32 -1.442695, %v2153_v41 }
0x1858   :  { %2876 = vpow2.f32 %v2469_v32 }
0x1859   :  { %2878 = vpow2.f32 %v2470_v43 }
0x1865   :  { %v2877_v33 = vpop.eup %2876 }
0x1866   :  { %v2879_v44 = vpop.eup %2878  ;;  %v2117_v34 = vadd.f32 1.0, %v2877_v33 }
0x1867   :  { %v2157_v3 = vadd.f32 1.0, %v2879_v44 }
0x1868   :  { %2880 = vrcp.f32 %v2117_v34 }
0x1869   :  { %2882 = vrcp.f32 %v2157_v3 }
0x1875   :  { %v2881_v10 = vpop.eup %2880 }
0x1876   :  { %v2883_v38 = vpop.eup %2882 }
0x18c4   :  { %v2122_v36 = vpop.permute.xlu0 %2121 }
0x18c5   :  { %v2124_v11 = vmul.f32 %v2881_v10, %v2122_v36 }
0x18c6   :  { %v2161_v12 = vpop.permute.xlu1 %2160 }
0x18c7   :  { %v2163_v19 = vmul.f32 %v2883_v38, %v2161_v12  ;;  %2126 = vrot.lane.b32.xlu0 %v2124_v11, %s2924_s29 }
0x18c9   :  { %2165 = vrot.lane.b32.xlu1 %v2163_v19, %s2924_s29 }
0x1939   :  { %v2127_v20 = vpop.permute.xlu0 %2126 }
0x193a   :  { %v2129_v40 = vadd.f32 %v2127_v20, %v2040_v37 }
0x193b   :  { %v2166_v21 = vpop.permute.xlu1 %2165 }
0x193c   :  { %2884 = vtanh.f32 %v2129_v40  ;;  %v2168_v22 = vadd.f32 %v2166_v21, %v3666_v16 }
0x193e   :  { %2886 = vtanh.f32 %v2168_v22 }
0x1949   :  { %v2885_v23 = vpop.eup %2884 }
0x194a   :  { %v2131_v24 = vsub.f32 %v3940_v47, %v2885_v23 }
0x194b   :  { %v2887_v25 = vpop.eup %2886 }
0x194c   :  { %2133 = vrot.lane.b32.xlu1 %v2131_v24, %s2925_s24  ;;  %v2171_v26 = vrot.slane %v2887_v25, 2 }
0x194e   :  { %v2173_v56 = vsub.f32 %v3944_v7, %v2171_v26 }
0x1950   :  { %v2175_v57 = vrot.slane %v2173_v56, 6 }
0x1952   :  { %2176 = vrot.lane.b32.xlu0 %v2175_v57, %s2925_s24 }
0x19be   :  { %v2134_v58 = vpop.permute.xlu1 %2133 }
0x19bf   :  { %v2136_v60 = vmul.f32 %v2881_v10, %v2134_v58 }
0x19c1   :  { %2138 = vrot.lane.b32.xlu1 %v2136_v60, %s2926_s14 }
0x19c4   :  { %v2177_v63 = vpop.permute.xlu0 %2176 }
0x19c5   :  { %v2179_v1 = vmul.f32 %v2883_v38, %v2177_v63 }
0x19c7   :  { %2181 = vrot.lane.b32.xlu0 %v2179_v1, %s2926_s14 }
0x1a33   :  { %v2139_v16 = vpop.permute.xlu1 %2138 }
0x1a34   :  { %v2141_v2 = vadd.f32 %v2885_v23, %v2139_v16 }
0x1a36   :  { %v2190_v4 = vrot.slane %v2141_v2, 2 }
0x1a38   :  { %2191 = vrot.lane.b32.xlu0 %v2190_v4, %s2925_s24 }
0x1a39   :  { %v2182_v6 = vpop.permute.xlu0 %2181 }
0x1a3a   :  { %v2184_v13 = vadd.f32 %v2887_v25, %v2182_v6 }
0x1a3c   :  { %2186 = vrot.lane.b32.xlu1 %v2184_v13, %s2924_s29  ;;  %v479_v13 = vld [vmem:[%s4051_s4 + $0x30] sm:$0x3] }
0x1aaa   :  { %v2192_v0 = vpop.permute.xlu0 %2191 }
0x1aae   :  { %v2187_v28 = vpop.permute.xlu1 %2186 }
0x1aaf   :  { %v2194_v39 = vsel %vm594_vm7, %v2187_v28, %v2192_v0 }
0x1ab0   :  { %v2195_v14 = vsel %vm189_vm2, %v2194_v39, 1.0 }
0x1ab1   :  { %v2197_v17 = vrot.slane %v2195_v14, 6 }
0x1ab3   :  { %2473 = vmatmul.mubr.msk.f32.vlgmr.msra.gmra.mxu0 %vm481_vm3, %v2197_v17  ;;  %2765 = vmatmul.mubr.msk.f32.vlgmr.msra.gmra.mxu1 %vm481_vm3, %v2197_v17 }
0x1b73   :  { %v2266_v18 = vpop.f32.mrf.mxu0  ;;  %v2336_v27 = vpop.f32.mrf.mxu1 }
0x1b74   :  { %2348 = vrot.lane.b32.xlu1 %v2336_v27, %s2924_s29 }
0x1b75   :  { %v2766_v53 = vpop.f32.mrf.mxu1  ;;  %v2267_v45 = vpop.f32.mrf.mxu0 }
0x1b76   :  { %v2340_v61 = vadd.f32 %v2336_v27, %v2267_v45 }
0x1b78   :  { %v2476_v46 = vmul.f32 -1.442695, %v2340_v61 }
0x1b7a   :  { %2888 = vpow2.f32 %v2476_v46 }
0x1b87   :  { %v2889_v49 = vpop.eup %2888 }
0x1b88   :  { %v2344_v50 = vadd.f32 1.0, %v2889_v49 }
0x1b8a   :  { %2890 = vrcp.f32 %v2344_v50 }
0x1b97   :  { %v2891_v7 = vpop.eup %2890 }
0x1be6   :  { %v2349_v51 = vpop.permute.xlu1 %2348 }
0x1be7   :  { %v2351_v52 = vmul.f32 %v2891_v7, %v2349_v51 }
0x1be9   :  { %2353 = vrot.lane.b32.xlu0 %v2351_v52, %s2924_s29 }
0x1bed   :  { %774 = vrot.lane.b32.xlu0 %v478_v8, %s2924_s29 }
0x1c5b   :  { %v2354_v54 = vpop.permute.xlu0 %2353 }
0x1c5c   :  { %v2356_v55 = vadd.f32 %v2354_v54, %v2267_v45 }
0x1c5e   :  { %2892 = vtanh.f32 %v2356_v55 }
0x1c5f   :  { %v775_v29 = vpop.permute.xlu0 %774 }
0x1c60   :  { %v777_v42 = vmul.f32 %v775_v29, %v3469_v48  ;;  %v1006_v35 = vmul.f32 %v3535_v62, %v775_v29  ;;  %v1234_v30 = vmul.f32 %v3601_v15, %v775_v29  ;;  %v1462_v41 = vmul.f32 %v3678_v5, %v775_v29 }
0x1c61   :  { %v1686_v48 = vmul.f32 %v3829_v9, %v775_v29  ;;  %v1914_v62 = vmul.f32 %v3940_v47, %v775_v29  ;;  %v2142_v32 = vmul.f32 %v2141_v2, %v775_v29 }
0x1c62   :  { %779 = vrot.lane.b32.xlu0 %v777_v42, %s2924_s29 }
0x1c66   :  { %1008 = vrot.lane.b32.xlu0 %v1006_v35, %s2924_s29 }
0x1c6a   :  { %1236 = vrot.lane.b32.xlu0 %v1234_v30, %s2924_s29 }
0x1c6b   :  { %v2893_v37 = vpop.eup %2892 }
0x1c6c   :  { %v2358_v31 = vsub.f32 %v2141_v2, %v2893_v37 }
0x1c6e   :  { %2360 = vrot.lane.b32.xlu1 %v2358_v31, %s2925_s24  ;;  %1464 = vrot.lane.b32.xlu0 %v1462_v41, %s2924_s29 }
0x1c72   :  { %1688 = vrot.lane.b32.xlu0 %v1686_v48, %s2924_s29 }
0x1c76   :  { %1916 = vrot.lane.b32.xlu0 %v1914_v62, %s2924_s29 }
0x1c7a   :  { %2144 = vrot.lane.b32.xlu0 %v2142_v32, %s2924_s29 }
0x1cd4   :  { %v780_v5 = vpop.permute.xlu0 %779 }
0x1cd5   :  { %v783_v9 = vsel %vm782_vm8, %v780_v5, 0.0 }
0x1cd8   :  { %v1009_v33 = vpop.permute.xlu0 %1008 }
0x1cd9   :  { %v1011_v22 = vsel %vm782_vm8, %v1009_v33, 0.0 }
0x1cdc   :  { %v1237_v44 = vpop.permute.xlu0 %1236 }
0x1cdd   :  { %v1239_v3 = vsel %vm782_vm8, %v1237_v44, 0.0 }
0x1ce0   :  { %v2361_v15 = vpop.permute.xlu1 %2360  ;;  %v1465_v34 = vpop.permute.xlu0 %1464 }
0x1ce1   :  { %v2363_v43 = vmul.f32 %v2891_v7, %v2361_v15  ;;  %v1467_v10 = vsel %vm782_vm8, %v1465_v34, 0.0 }
0x1ce3   :  { %2365 = vrot.lane.b32.xlu1 %v2363_v43, %s2926_s14  ;;  %s2927_s14 = smov 72  }
0x1ce4   :  { %v1689_v47 = vpop.permute.xlu0 %1688 }
0x1ce5   :  { %v1691_v11 = vsel %vm782_vm8, %v1689_v47, 0.0 }
0x1ce8   :  { %v1917_v36 = vpop.permute.xlu0 %1916 }
0x1ce9   :  { %v1919_v38 = vsel %vm782_vm8, %v1917_v36, 0.0 }
0x1cec   :  { %v2145_v12 = vpop.permute.xlu0 %2144 }
0x1ced   :  { %v2147_v19 = vsel %vm782_vm8, %v2145_v12, 0.0 }
0x1d07   :  { %784 = vadd.xlane.f32.xlu1 %v783_v9 }
0x1d0b   :  { %1240 = vadd.xlane.f32.xlu1 %v1239_v3 }
0x1d0f   :  { %1468 = vadd.xlane.f32.xlu1 %v1467_v10 }
0x1d13   :  { %1692 = vadd.xlane.f32.xlu1 %v1691_v11 }
0x1d17   :  { %1920 = vadd.xlane.f32.xlu1 %v1919_v38 }
0x1d1b   :  { %2148 = vadd.xlane.f32.xlu1 %v2147_v19 }
0x1d55   :  { %v2366_v20 = vpop.permute.xlu1 %2365 }
0x1d56   :  { %v2368_v40 = vadd.f32 %v2893_v37, %v2366_v20 }
0x1d58   :  { %v2369_v21 = vmul.f32 %v2368_v40, %v775_v29 }
0x1d5a   :  { %2371 = vrot.lane.b32.xlu0 %v2369_v21, %s2924_s29 }
0x1d79   :  { %1012 = vadd.xlane.f32.xlu0 %v1011_v22 }
0x1d90   :  { %v785_v25 = vpop.xlane.xlu1 %784 }
0x1d94   :  { %v1241_v26 = vpop.xlane.xlu1 %1240 }
0x1d98   :  { %v1469_v56 = vpop.xlane.xlu1 %1468 }
0x1d9c   :  { %v1693_v58 = vpop.xlane.xlu1 %1692 }
0x1da0   :  { %v1921_v1 = vpop.xlane.xlu1 %1920 }
0x1da4   :  { %v2149_v4 = vpop.xlane.xlu1 %2148 }
0x1dcc   :  { %v2372_v23 = vpop.permute.xlu0 %2371 }
0x1dcd   :  { %v2374_v24 = vsel %vm782_vm8, %v2372_v23, 0.0 }
0x1dce   :  { %2375 = vadd.xlane.f32.xlu1 %v2374_v24 }
0x1e02   :  { %v1013_v57 = vpop.xlane.xlu0 %1012 }
0x1e03   :  { %v2378_v60 = vsel %vm2377_vm9, %v785_v25, %v1013_v57 }
0x1e04   :  { %v2380_v63 = vsel %vm2379_vm10, %v2378_v60, %v1241_v26 }
0x1e05   :  { %v2382_v16 = vsel %vm2381_vm11, %v2380_v63, %v1469_v56 }
0x1e06   :  { %v2384_v2 = vsel %vm2383_vm12, %v2382_v16, %v1693_v58 }
0x1e07   :  { %v2386_v6 = vsel %vm2385_vm13, %v2384_v2, %v1921_v1 }
0x1e08   :  { %v2388_v28 = vsel %vm2387_vm14, %v2386_v6, %v2149_v4 }
0x1e57   :  { %v2376_v0 = vpop.xlane.xlu1 %2375 }
0x1e58   :  { %v2390_v39 = vsel %vm2389_vm15, %v2388_v28, %v2376_v0 }
0x1e59   :  { %v2391_v14 = vadd.f32 %v2390_v39, %v479_v13 }
0x1e5b   :  { %2393 = vrot.lane.b32.xlu1 %v2391_v14, %s2927_s14 }
0x1ecd   :  { %v2394_v17 = vpop.permute.xlu1 %2393 }
0x1ece   :  { %v2396_v18 = vsel %vm369_vm6, %v3329_v59, %v2394_v17 }
0x1ecf   :  { %2398 = vst.msk [vmem:[%s4052_s5] sm:$0x3] %vm2397_vm0, %v2396_v18 }

</bundles_post_ra>
